<compile_context>
chip_gen: v7x
topology: tpu7x:2x2x1
jax: 0.10.0
libtpu: 0.0.40
codegen_flags: <defaults>
</compile_context>

<pallas_src>
import jax
import jax.numpy as jnp
import numpy as np
from jax import lax
from jax.experimental import pallas as pl
from jax.experimental.pallas import tpu as pltpu

INPUT_SIZE = 300   # input_size in the PyTorch module
HIDDEN = 60        # gru_len = hidden_size = 60
GP = 128           # padded lanes per gate (one full 128-lane vreg tile)


def _gru_fused_kernel(gi_ref, whh_ref, bhh_ref, dmask_ref, out_ref):
    """Fused bidirectional GRU recurrence, fully VMEM-resident, single call.

    gi_ref   : (T, 2B, 3*GP) precomputed x @ W_ih^T + b_ih (gate order r|z|n,
               each gate padded to 128 lanes). Rows [0:B] = forward at time t,
               rows [B:2B] = reverse at time T-1-t (pre-flipped in wrapper).
    whh_ref  : (2*GP, 3*GP)  block-diagonal padded recurrent weights:
               rows [0:GP] = W_hh_f^T (zero-padded), rows [GP:2GP] = W_hh_b^T.
    bhh_ref  : (2B, 3*GP)    per-row b_hh (forward rows / reverse rows).
    dmask_ref: (2B, 2*GP)    direction mask building the block-diagonal hidden
               operand (fwd rows select lanes [0:GP], rev rows lanes [GP:2GP]).
    out_ref  : (T, 2B, GP)   lane-dense per-step hidden states.

    PyTorch GRU gate equations (gate order r, z, n):
        r  = sigmoid(Wir x + bir + Whr h + bhr)
        z  = sigmoid(Wiz x + biz + Whz h + bhz)
        n  = tanh  (Win x + bin + r * (Whn h + bhn))
        h' = (1 - z) * n + z * h
    """
    T = gi_ref.shape[0]
    rows = gi_ref.shape[1]          # 2B

    # Hoist loop-invariant loads out of the serial loop.
    whh = whh_ref[...]              # (2GP, 3GP)
    bhh = bhh_ref[...]              # (2B, 3GP)
    dmask = dmask_ref[...]          # (2B, 2GP)

    def step(t, h):                 # h: (2B, GP) f32
        gi = gi_ref[t]                                        # (2B, 3GP)
        # Block-diagonal hidden operand: forward rows only hit forward
        # weight rows, reverse rows only hit reverse weight rows.
        h2 = jnp.concatenate([h, h], axis=-1) * dmask          # (2B, 2GP)
        gh = jnp.dot(h2, whh, preferred_element_type=jnp.float32) + bhh
        r = jax.nn.sigmoid(gi[:, 0:GP] + gh[:, 0:GP])
        z = jax.nn.sigmoid(gi[:, GP:2 * GP] + gh[:, GP:2 * GP])
        n = jnp.tanh(gi[:, 2 * GP:3 * GP] + r * gh[:, 2 * GP:3 * GP])
        h_new = (1.0 - z) * n + z * h
        out_ref[t] = h_new.astype(out_ref.dtype)               # lane-dense store
        return h_new

    h0 = jnp.zeros((rows, GP), jnp.float32)                    # h_0 = 0
    lax.fori_loop(0, T, step, h0, unroll=(T <= 16))


def _pad_gates(w, h=HIDDEN, gp=GP):
    """(rows, 3H) with gates r|z|n -> (rows, 3*gp), each gate zero-padded to
    its own 128-lane tile. Padded columns are zero so padded lanes stay inert."""
    parts = [w[:, g * h:(g + 1) * h] for g in range(3)]
    parts = [jnp.pad(p, ((0, 0), (0, gp - h))) for p in parts]
    return jnp.concatenate(parts, axis=1)


def gru_layer(x, params):
    """Bidirectional GRU forward, equivalent to `self.gru(x)` with h_0 = 0.
    x: (T, B, I). Returns (output, h_n): output (T, B, 2H), h_n (2, B, H)."""
    (wih_f, whh_f, bih_f, bhh_f, wih_b, whh_b, bih_b, bhh_b) = params
    T, B, _ = x.shape
    H = HIDDEN

    # ---- Hoisted input projection: one batched matmul for both directions
    # (no sequential dependency), biases folded in. Done in plain XLA. ----
    wih_both = jnp.concatenate([_pad_gates(wih_f), _pad_gates(wih_b)], axis=1)  # (I, 6GP)
    gi_both = jnp.einsum('tbi,ig->tbg', x, wih_both,
                         preferred_element_type=jnp.float32)                    # (T,B,6GP)
    gi_f = gi_both[..., :3 * GP] + _pad_gates(bih_f)                            # (T,B,3GP)
    gi_b = gi_both[..., 3 * GP:] + _pad_gates(bih_b)                            # (T,B,3GP)
    # Reverse direction pre-flipped in time: loop step t handles position T-1-t.
    gi = jnp.concatenate([gi_f, gi_b[::-1]], axis=1)                            # (T,2B,3GP)

    # ---- Block-diagonal padded recurrent weights (fwd rows 0:GP, rev GP:2GP).
    whh_blk = jnp.zeros((2 * GP, 3 * GP), jnp.float32)
    whh_blk = whh_blk.at[:H, :].set(_pad_gates(whh_f))
    whh_blk = whh_blk.at[GP:GP + H, :].set(_pad_gates(whh_b))

    bhh = jnp.concatenate(
        [jnp.broadcast_to(_pad_gates(bhh_f), (B, 3 * GP)),
         jnp.broadcast_to(_pad_gates(bhh_b), (B, 3 * GP))], axis=0)             # (2B,3GP)

    dmask = jnp.concatenate(
        [jnp.concatenate([jnp.ones((B, GP)), jnp.zeros((B, GP))], axis=1),
         jnp.concatenate([jnp.zeros((B, GP)), jnp.ones((B, GP))], axis=1)],
        axis=0).astype(jnp.float32)                                             # (2B,2GP)

    vmem = pl.BlockSpec(memory_space=pltpu.MemorySpace.VMEM)
    out = pl.pallas_call(
        _gru_fused_kernel,
        out_shape=jax.ShapeDtypeStruct((T, 2 * B, GP), jnp.float32),
        in_specs=[vmem, vmem, vmem, vmem],     # everything fully VMEM-resident
        out_specs=vmem,
    )(gi, whh_blk, bhh, dmask)

    # Un-pad / un-flip (tiny arrays; negligible HBM traffic).
    out_f = out[:, :B, :H]                       # (T, B, H)
    out_b = out[:, B:, :H][::-1]                 # back to original time order
    output = jnp.concatenate([out_f, out_b], axis=-1)          # (T, B, 2H)
    h_n = jnp.stack([out_f[-1], out_b[0]], axis=0)             # (2, B, H)
    return output, h_n


def _gru_ref_single(x, w_ih, w_hh, b_ih, b_hh):
    """Pure-JAX reference (lax.scan) for correctness check."""
    H = HIDDEN

    def step(h, xt):
        gi = xt @ w_ih + b_ih[0]
        gh = h @ w_hh + b_hh[0]
        r = jax.nn.sigmoid(gi[:, :H] + gh[:, :H])
        z = jax.nn.sigmoid(gi[:, H:2 * H] + gh[:, H:2 * H])
        n = jnp.tanh(gi[:, 2 * H:] + r * gh[:, 2 * H:])
        h_new = (1.0 - z) * n + z * h
        return h_new, h_new

    h0 = jnp.zeros((x.shape[1], H), jnp.float32)
    _, ys = jax.lax.scan(step, h0, x)
    return ys


def _init_params(key):
    """Deterministic parameter init (shapes as in nn.GRU(300, 60, bidirectional=True)).
    Stored pre-transposed: W_ih^T (I, 3H), W_hh^T (H, 3H), biases (1, 3H)."""
    H, I = HIDDEN, INPUT_SIZE
    ks = jax.random.split(key, 8)
    scale_ih = 1.0 / np.sqrt(I)
    scale_hh = 1.0 / np.sqrt(H)
    wih_f = jax.random.uniform(ks[0], (I, 3 * H), jnp.float32, -scale_ih, scale_ih)
    whh_f = jax.random.uniform(ks[1], (H, 3 * H), jnp.float32, -scale_hh, scale_hh)
    bih_f = jax.random.uniform(ks[2], (1, 3 * H), jnp.float32, -scale_hh, scale_hh)
    bhh_f = jax.random.uniform(ks[3], (1, 3 * H), jnp.float32, -scale_hh, scale_hh)
    wih_b = jax.random.uniform(ks[4], (I, 3 * H), jnp.float32, -scale_ih, scale_ih)
    whh_b = jax.random.uniform(ks[5], (H, 3 * H), jnp.float32, -scale_hh, scale_hh)
    bih_b = jax.random.uniform(ks[6], (1, 3 * H), jnp.float32, -scale_hh, scale_hh)
    bhh_b = jax.random.uniform(ks[7], (1, 3 * H), jnp.float32, -scale_hh, scale_hh)
    return (wih_f, whh_f, bih_f, bhh_f, wih_b, whh_b, bih_b, bhh_b)


if __name__ == "__main__":
    key = jax.random.PRNGKey(0)
    k_x, k_p = jax.random.split(key)

    T, B = 8, 4   # small seq length / batch
    x = jax.random.normal(k_x, (T, B, INPUT_SIZE), jnp.float32)
    params = _init_params(k_p)

    output, h_n = jax.block_until_ready(jax.jit(gru_layer)(x, params))
    assert output.shape == (T, B, 2 * HIDDEN)
    assert h_n.shape == (2, B, HIDDEN)

    # correctness check against pure-JAX reference
    (wih_f, whh_f, bih_f, bhh_f, wih_b, whh_b, bih_b, bhh_b) = params
    ref_f = _gru_ref_single(x, wih_f, whh_f, bih_f, bhh_f)
    ref_b = _gru_ref_single(x[::-1], wih_b, whh_b, bih_b, bhh_b)[::-1]
    ref_out = jnp.concatenate([ref_f, ref_b], axis=-1)
    ref_hn = jnp.stack([ref_f[-1], ref_b[0]], axis=0)

    np.testing.assert_allclose(np.asarray(output), np.asarray(ref_out), rtol=1e-2, atol=1e-2)
    np.testing.assert_allclose(np.asarray(h_n), np.asarray(ref_hn), rtol=1e-2, atol=1e-2)

    print("KERNEL_OK")
</pallas_src>

<mosaic_0001>
module attributes {stable_mosaic.version = 11 : i64} {
  func.func @_gru_fused_kernel(%arg0: memref<8x8x384xf32, #tpu.memory_space<vmem>>, %arg1: memref<256x384xf32, #tpu.memory_space<vmem>>, %arg2: memref<8x384xf32, #tpu.memory_space<vmem>>, %arg3: memref<8x256xf32, #tpu.memory_space<vmem>>, %arg4: memref<8x8x128xf32, #tpu.memory_space<vmem>>) attributes {dimension_semantics = [], scalar_prefetch = 0 : i64, scratch_operands = 0 : i64, tpu.core_type = #tpu.core_type<tc>} {
    %c0 = arith.constant 0 : index
    %c0_0 = arith.constant 0 : index
    %0 = vector.load %arg1[%c0, %c0_0] : memref<256x384xf32, #tpu.memory_space<vmem>>, vector<256x384xf32>
    %c0_1 = arith.constant 0 : index
    %c0_2 = arith.constant 0 : index
    %1 = vector.load %arg2[%c0_1, %c0_2] : memref<8x384xf32, #tpu.memory_space<vmem>>, vector<8x384xf32>
    %c0_3 = arith.constant 0 : index
    %c0_4 = arith.constant 0 : index
    %2 = vector.load %arg3[%c0_3, %c0_4] : memref<8x256xf32, #tpu.memory_space<vmem>>, vector<8x256xf32>
    %cst = arith.constant 0.000000e+00 : f32
    %3 = vector.broadcast %cst : f32 to vector<8x128xf32>
    %c0_i32 = arith.constant 0 : i32
    %4 = arith.index_cast %c0_i32 : i32 to index
    %c0_5 = arith.constant 0 : index
    %c0_6 = arith.constant 0 : index
    %5 = vector.load %arg0[%4, %c0_5, %c0_6] : memref<8x8x384xf32, #tpu.memory_space<vmem>>, vector<1x8x384xf32>
    %6 = vector.shape_cast %5 : vector<1x8x384xf32> to vector<8x384xf32>
    %7 = tpu.concatenate %3, %3 in 1 : vector<8x128xf32>, vector<8x128xf32> -> vector<8x256xf32>
    %8 = arith.mulf %7, %2 : vector<8x256xf32>
    %cst_7 = arith.constant dense<0.000000e+00> : vector<8x384xf32>
    %9 = tpu.matmul %8, %0, %cst_7 {dimension_numbers = #tpu.dot_dimension_numbers<[1], [0], [0], [1], [0, 0, 1, 1], [], []>} : vector<8x256xf32>, vector<256x384xf32>, vector<8x384xf32> -> vector<8x384xf32>
    %10 = arith.addf %9, %1 : vector<8x384xf32>
    %11 = vector.extract_strided_slice %6 {offsets = [0, 0], sizes = [8, 128], strides = [1, 1]} : vector<8x384xf32> to vector<8x128xf32>
    %12 = vector.extract_strided_slice %10 {offsets = [0, 0], sizes = [8, 128], strides = [1, 1]} : vector<8x384xf32> to vector<8x128xf32>
    %13 = arith.addf %11, %12 : vector<8x128xf32>
    %14 = arith.negf %13 : vector<8x128xf32>
    %15 = math.exp %14 : vector<8x128xf32>
    %cst_8 = arith.constant 1.000000e+00 : f32
    %16 = vector.broadcast %cst_8 : f32 to vector<8x128xf32>
    %17 = arith.addf %16, %15 : vector<8x128xf32>
    %18 = arith.divf %16, %17 : vector<8x128xf32>
    %19 = vector.extract_strided_slice %6 {offsets = [0, 128], sizes = [8, 128], strides = [1, 1]} : vector<8x384xf32> to vector<8x128xf32>
    %20 = vector.extract_strided_slice %10 {offsets = [0, 128], sizes = [8, 128], strides = [1, 1]} : vector<8x384xf32> to vector<8x128xf32>
    %21 = arith.addf %19, %20 : vector<8x128xf32>
    %22 = arith.negf %21 : vector<8x128xf32>
    %23 = math.exp %22 : vector<8x128xf32>
    %cst_9 = arith.constant 1.000000e+00 : f32
    %24 = vector.broadcast %cst_9 : f32 to vector<8x128xf32>
    %25 = arith.addf %24, %23 : vector<8x128xf32>
    %26 = arith.divf %24, %25 : vector<8x128xf32>
    %27 = vector.extract_strided_slice %6 {offsets = [0, 256], sizes = [8, 128], strides = [1, 1]} : vector<8x384xf32> to vector<8x128xf32>
    %28 = vector.extract_strided_slice %10 {offsets = [0, 256], sizes = [8, 128], strides = [1, 1]} : vector<8x384xf32> to vector<8x128xf32>
    %29 = arith.mulf %18, %28 : vector<8x128xf32>
    %30 = arith.addf %27, %29 : vector<8x128xf32>
    %31 = math.tanh %30 : vector<8x128xf32>
    %cst_10 = arith.constant 1.000000e+00 : f32
    %32 = vector.broadcast %cst_10 : f32 to vector<8x128xf32>
    %33 = arith.subf %32, %26 : vector<8x128xf32>
    %34 = arith.mulf %33, %31 : vector<8x128xf32>
    %35 = arith.mulf %26, %3 : vector<8x128xf32>
    %36 = arith.addf %34, %35 : vector<8x128xf32>
    %37 = arith.index_cast %c0_i32 : i32 to index
    %c0_11 = arith.constant 0 : index
    %c0_12 = arith.constant 0 : index
    %38 = vector.load %arg4[%37, %c0_11, %c0_12] : memref<8x8x128xf32, #tpu.memory_space<vmem>>, vector<1x8x128xf32>
    %39 = vector.shape_cast %38 : vector<1x8x128xf32> to vector<8x128xf32>
    %40 = vector.shape_cast %36 : vector<8x128xf32> to vector<1x8x128xf32>
    tpu.vector_store %arg4[%37, %c0_11, %c0_12], %40 {strides = array<i32>} : memref<8x8x128xf32, #tpu.memory_space<vmem>>, vector<1x8x128xf32>,
    %c1_i32 = arith.constant 1 : i32
    %41 = arith.index_cast %c1_i32 : i32 to index
    %c0_13 = arith.constant 0 : index
    %c0_14 = arith.constant 0 : index
    %42 = vector.load %arg0[%41, %c0_13, %c0_14] : memref<8x8x384xf32, #tpu.memory_space<vmem>>, vector<1x8x384xf32>
    %43 = vector.shape_cast %42 : vector<1x8x384xf32> to vector<8x384xf32>
    %44 = tpu.concatenate %36, %36 in 1 : vector<8x128xf32>, vector<8x128xf32> -> vector<8x256xf32>
    %45 = arith.mulf %44, %2 : vector<8x256xf32>
    %cst_15 = arith.constant dense<0.000000e+00> : vector<8x384xf32>
    %46 = tpu.matmul %45, %0, %cst_15 {dimension_numbers = #tpu.dot_dimension_numbers<[1], [0], [0], [1], [0, 0, 1, 1], [], []>} : vector<8x256xf32>, vector<256x384xf32>, vector<8x384xf32> -> vector<8x384xf32>
    %47 = arith.addf %46, %1 : vector<8x384xf32>
    %48 = vector.extract_strided_slice %43 {offsets = [0, 0], sizes = [8, 128], strides = [1, 1]} : vector<8x384xf32> to vector<8x128xf32>
    %49 = vector.extract_strided_slice %47 {offsets = [0, 0], sizes = [8, 128], strides = [1, 1]} : vector<8x384xf32> to vector<8x128xf32>
    %50 = arith.addf %48, %49 : vector<8x128xf32>
    %51 = arith.negf %50 : vector<8x128xf32>
    %52 = math.exp %51 : vector<8x128xf32>
    %cst_16 = arith.constant 1.000000e+00 : f32
    %53 = vector.broadcast %cst_16 : f32 to vector<8x128xf32>
    %54 = arith.addf %53, %52 : vector<8x128xf32>
    %55 = arith.divf %53, %54 : vector<8x128xf32>
    %56 = vector.extract_strided_slice %43 {offsets = [0, 128], sizes = [8, 128], strides = [1, 1]} : vector<8x384xf32> to vector<8x128xf32>
    %57 = vector.extract_strided_slice %47 {offsets = [0, 128], sizes = [8, 128], strides = [1, 1]} : vector<8x384xf32> to vector<8x128xf32>
    %58 = arith.addf %56, %57 : vector<8x128xf32>
    %59 = arith.negf %58 : vector<8x128xf32>
    %60 = math.exp %59 : vector<8x128xf32>
    %cst_17 = arith.constant 1.000000e+00 : f32
    %61 = vector.broadcast %cst_17 : f32 to vector<8x128xf32>
    %62 = arith.addf %61, %60 : vector<8x128xf32>
    %63 = arith.divf %61, %62 : vector<8x128xf32>
    %64 = vector.extract_strided_slice %43 {offsets = [0, 256], sizes = [8, 128], strides = [1, 1]} : vector<8x384xf32> to vector<8x128xf32>
    %65 = vector.extract_strided_slice %47 {offsets = [0, 256], sizes = [8, 128], strides = [1, 1]} : vector<8x384xf32> to vector<8x128xf32>
    %66 = arith.mulf %55, %65 : vector<8x128xf32>
    %67 = arith.addf %64, %66 : vector<8x128xf32>
    %68 = math.tanh %67 : vector<8x128xf32>
    %cst_18 = arith.constant 1.000000e+00 : f32
    %69 = vector.broadcast %cst_18 : f32 to vector<8x128xf32>
    %70 = arith.subf %69, %63 : vector<8x128xf32>
    %71 = arith.mulf %70, %68 : vector<8x128xf32>
    %72 = arith.mulf %63, %36 : vector<8x128xf32>
    %73 = arith.addf %71, %72 : vector<8x128xf32>
    %74 = arith.index_cast %c1_i32 : i32 to index
    %c0_19 = arith.constant 0 : index
    %c0_20 = arith.constant 0 : index
    %75 = vector.load %arg4[%74, %c0_19, %c0_20] : memref<8x8x128xf32, #tpu.memory_space<vmem>>, vector<1x8x128xf32>
    %76 = vector.shape_cast %75 : vector<1x8x128xf32> to vector<8x128xf32>
    %77 = vector.shape_cast %73 : vector<8x128xf32> to vector<1x8x128xf32>
    tpu.vector_store %arg4[%74, %c0_19, %c0_20], %77 {strides = array<i32>} : memref<8x8x128xf32, #tpu.memory_space<vmem>>, vector<1x8x128xf32>,
    %c2_i32 = arith.constant 2 : i32
    %78 = arith.index_cast %c2_i32 : i32 to index
    %c0_21 = arith.constant 0 : index
    %c0_22 = arith.constant 0 : index
    %79 = vector.load %arg0[%78, %c0_21, %c0_22] : memref<8x8x384xf32, #tpu.memory_space<vmem>>, vector<1x8x384xf32>
    %80 = vector.shape_cast %79 : vector<1x8x384xf32> to vector<8x384xf32>
    %81 = tpu.concatenate %73, %73 in 1 : vector<8x128xf32>, vector<8x128xf32> -> vector<8x256xf32>
    %82 = arith.mulf %81, %2 : vector<8x256xf32>
    %cst_23 = arith.constant dense<0.000000e+00> : vector<8x384xf32>
    %83 = tpu.matmul %82, %0, %cst_23 {dimension_numbers = #tpu.dot_dimension_numbers<[1], [0], [0], [1], [0, 0, 1, 1], [], []>} : vector<8x256xf32>, vector<256x384xf32>, vector<8x384xf32> -> vector<8x384xf32>
    %84 = arith.addf %83, %1 : vector<8x384xf32>
    %85 = vector.extract_strided_slice %80 {offsets = [0, 0], sizes = [8, 128], strides = [1, 1]} : vector<8x384xf32> to vector<8x128xf32>
    %86 = vector.extract_strided_slice %84 {offsets = [0, 0], sizes = [8, 128], strides = [1, 1]} : vector<8x384xf32> to vector<8x128xf32>
    %87 = arith.addf %85, %86 : vector<8x128xf32>
    %88 = arith.negf %87 : vector<8x128xf32>
    %89 = math.exp %88 : vector<8x128xf32>
    %cst_24 = arith.constant 1.000000e+00 : f32
    %90 = vector.broadcast %cst_24 : f32 to vector<8x128xf32>
    %91 = arith.addf %90, %89 : vector<8x128xf32>
    %92 = arith.divf %90, %91 : vector<8x128xf32>
    %93 = vector.extract_strided_slice %80 {offsets = [0, 128], sizes = [8, 128], strides = [1, 1]} : vector<8x384xf32> to vector<8x128xf32>
    %94 = vector.extract_strided_slice %84 {offsets = [0, 128], sizes = [8, 128], strides = [1, 1]} : vector<8x384xf32> to vector<8x128xf32>
    %95 = arith.addf %93, %94 : vector<8x128xf32>
    %96 = arith.negf %95 : vector<8x128xf32>
    %97 = math.exp %96 : vector<8x128xf32>
    %cst_25 = arith.constant 1.000000e+00 : f32
    %98 = vector.broadcast %cst_25 : f32 to vector<8x128xf32>
    %99 = arith.addf %98, %97 : vector<8x128xf32>
    %100 = arith.divf %98, %99 : vector<8x128xf32>
    %101 = vector.extract_strided_slice %80 {offsets = [0, 256], sizes = [8, 128], strides = [1, 1]} : vector<8x384xf32> to vector<8x128xf32>
    %102 = vector.extract_strided_slice %84 {offsets = [0, 256], sizes = [8, 128], strides = [1, 1]} : vector<8x384xf32> to vector<8x128xf32>
    %103 = arith.mulf %92, %102 : vector<8x128xf32>
    %104 = arith.addf %101, %103 : vector<8x128xf32>
    %105 = math.tanh %104 : vector<8x128xf32>
    %cst_26 = arith.constant 1.000000e+00 : f32
    %106 = vector.broadcast %cst_26 : f32 to vector<8x128xf32>
    %107 = arith.subf %106, %100 : vector<8x128xf32>
    %108 = arith.mulf %107, %105 : vector<8x128xf32>
    %109 = arith.mulf %100, %73 : vector<8x128xf32>
    %110 = arith.addf %108, %109 : vector<8x128xf32>
    %111 = arith.index_cast %c2_i32 : i32 to index
    %c0_27 = arith.constant 0 : index
    %c0_28 = arith.constant 0 : index
    %112 = vector.load %arg4[%111, %c0_27, %c0_28] : memref<8x8x128xf32, #tpu.memory_space<vmem>>, vector<1x8x128xf32>
    %113 = vector.shape_cast %112 : vector<1x8x128xf32> to vector<8x128xf32>
    %114 = vector.shape_cast %110 : vector<8x128xf32> to vector<1x8x128xf32>
    tpu.vector_store %arg4[%111, %c0_27, %c0_28], %114 {strides = array<i32>} : memref<8x8x128xf32, #tpu.memory_space<vmem>>, vector<1x8x128xf32>,
    %c3_i32 = arith.constant 3 : i32
    %115 = arith.index_cast %c3_i32 : i32 to index
    %c0_29 = arith.constant 0 : index
    %c0_30 = arith.constant 0 : index
    %116 = vector.load %arg0[%115, %c0_29, %c0_30] : memref<8x8x384xf32, #tpu.memory_space<vmem>>, vector<1x8x384xf32>
    %117 = vector.shape_cast %116 : vector<1x8x384xf32> to vector<8x384xf32>
    %118 = tpu.concatenate %110, %110 in 1 : vector<8x128xf32>, vector<8x128xf32> -> vector<8x256xf32>
    %119 = arith.mulf %118, %2 : vector<8x256xf32>
    %cst_31 = arith.constant dense<0.000000e+00> : vector<8x384xf32>
    %120 = tpu.matmul %119, %0, %cst_31 {dimension_numbers = #tpu.dot_dimension_numbers<[1], [0], [0], [1], [0, 0, 1, 1], [], []>} : vector<8x256xf32>, vector<256x384xf32>, vector<8x384xf32> -> vector<8x384xf32>
    %121 = arith.addf %120, %1 : vector<8x384xf32>
    %122 = vector.extract_strided_slice %117 {offsets = [0, 0], sizes = [8, 128], strides = [1, 1]} : vector<8x384xf32> to vector<8x128xf32>
    %123 = vector.extract_strided_slice %121 {offsets = [0, 0], sizes = [8, 128], strides = [1, 1]} : vector<8x384xf32> to vector<8x128xf32>
    %124 = arith.addf %122, %123 : vector<8x128xf32>
    %125 = arith.negf %124 : vector<8x128xf32>
    %126 = math.exp %125 : vector<8x128xf32>
    %cst_32 = arith.constant 1.000000e+00 : f32
    %127 = vector.broadcast %cst_32 : f32 to vector<8x128xf32>
    %128 = arith.addf %127, %126 : vector<8x128xf32>
    %129 = arith.divf %127, %128 : vector<8x128xf32>
    %130 = vector.extract_strided_slice %117 {offsets = [0, 128], sizes = [8, 128], strides = [1, 1]} : vector<8x384xf32> to vector<8x128xf32>
    %131 = vector.extract_strided_slice %121 {offsets = [0, 128], sizes = [8, 128], strides = [1, 1]} : vector<8x384xf32> to vector<8x128xf32>
    %132 = arith.addf %130, %131 : vector<8x128xf32>
    %133 = arith.negf %132 : vector<8x128xf32>
    %134 = math.exp %133 : vector<8x128xf32>
    %cst_33 = arith.constant 1.000000e+00 : f32
    %135 = vector.broadcast %cst_33 : f32 to vector<8x128xf32>
    %136 = arith.addf %135, %134 : vector<8x128xf32>
    %137 = arith.divf %135, %136 : vector<8x128xf32>
    %138 = vector.extract_strided_slice %117 {offsets = [0, 256], sizes = [8, 128], strides = [1, 1]} : vector<8x384xf32> to vector<8x128xf32>
    %139 = vector.extract_strided_slice %121 {offsets = [0, 256], sizes = [8, 128], strides = [1, 1]} : vector<8x384xf32> to vector<8x128xf32>
    %140 = arith.mulf %129, %139 : vector<8x128xf32>
    %141 = arith.addf %138, %140 : vector<8x128xf32>
    %142 = math.tanh %141 : vector<8x128xf32>
    %cst_34 = arith.constant 1.000000e+00 : f32
    %143 = vector.broadcast %cst_34 : f32 to vector<8x128xf32>
    %144 = arith.subf %143, %137 : vector<8x128xf32>
    %145 = arith.mulf %144, %142 : vector<8x128xf32>
    %146 = arith.mulf %137, %110 : vector<8x128xf32>
    %147 = arith.addf %145, %146 : vector<8x128xf32>
    %148 = arith.index_cast %c3_i32 : i32 to index
    %c0_35 = arith.constant 0 : index
    %c0_36 = arith.constant 0 : index
    %149 = vector.load %arg4[%148, %c0_35, %c0_36] : memref<8x8x128xf32, #tpu.memory_space<vmem>>, vector<1x8x128xf32>
    %150 = vector.shape_cast %149 : vector<1x8x128xf32> to vector<8x128xf32>
    %151 = vector.shape_cast %147 : vector<8x128xf32> to vector<1x8x128xf32>
    tpu.vector_store %arg4[%148, %c0_35, %c0_36], %151 {strides = array<i32>} : memref<8x8x128xf32, #tpu.memory_space<vmem>>, vector<1x8x128xf32>,
    %c4_i32 = arith.constant 4 : i32
    %152 = arith.index_cast %c4_i32 : i32 to index
    %c0_37 = arith.constant 0 : index
    %c0_38 = arith.constant 0 : index
    %153 = vector.load %arg0[%152, %c0_37, %c0_38] : memref<8x8x384xf32, #tpu.memory_space<vmem>>, vector<1x8x384xf32>
    %154 = vector.shape_cast %153 : vector<1x8x384xf32> to vector<8x384xf32>
    %155 = tpu.concatenate %147, %147 in 1 : vector<8x128xf32>, vector<8x128xf32> -> vector<8x256xf32>
    %156 = arith.mulf %155, %2 : vector<8x256xf32>
    %cst_39 = arith.constant dense<0.000000e+00> : vector<8x384xf32>
    %157 = tpu.matmul %156, %0, %cst_39 {dimension_numbers = #tpu.dot_dimension_numbers<[1], [0], [0], [1], [0, 0, 1, 1], [], []>} : vector<8x256xf32>, vector<256x384xf32>, vector<8x384xf32> -> vector<8x384xf32>
    %158 = arith.addf %157, %1 : vector<8x384xf32>
    %159 = vector.extract_strided_slice %154 {offsets = [0, 0], sizes = [8, 128], strides = [1, 1]} : vector<8x384xf32> to vector<8x128xf32>
    %160 = vector.extract_strided_slice %158 {offsets = [0, 0], sizes = [8, 128], strides = [1, 1]} : vector<8x384xf32> to vector<8x128xf32>
    %161 = arith.addf %159, %160 : vector<8x128xf32>
    %162 = arith.negf %161 : vector<8x128xf32>
    %163 = math.exp %162 : vector<8x128xf32>
    %cst_40 = arith.constant 1.000000e+00 : f32
    %164 = vector.broadcast %cst_40 : f32 to vector<8x128xf32>
    %165 = arith.addf %164, %163 : vector<8x128xf32>
    %166 = arith.divf %164, %165 : vector<8x128xf32>
    %167 = vector.extract_strided_slice %154 {offsets = [0, 128], sizes = [8, 128], strides = [1, 1]} : vector<8x384xf32> to vector<8x128xf32>
    %168 = vector.extract_strided_slice %158 {offsets = [0, 128], sizes = [8, 128], strides = [1, 1]} : vector<8x384xf32> to vector<8x128xf32>
    %169 = arith.addf %167, %168 : vector<8x128xf32>
    %170 = arith.negf %169 : vector<8x128xf32>
    %171 = math.exp %170 : vector<8x128xf32>
    %cst_41 = arith.constant 1.000000e+00 : f32
    %172 = vector.broadcast %cst_41 : f32 to vector<8x128xf32>
    %173 = arith.addf %172, %171 : vector<8x128xf32>
    %174 = arith.divf %172, %173 : vector<8x128xf32>
    %175 = vector.extract_strided_slice %154 {offsets = [0, 256], sizes = [8, 128], strides = [1, 1]} : vector<8x384xf32> to vector<8x128xf32>
    %176 = vector.extract_strided_slice %158 {offsets = [0, 256], sizes = [8, 128], strides = [1, 1]} : vector<8x384xf32> to vector<8x128xf32>
    %177 = arith.mulf %166, %176 : vector<8x128xf32>
    %178 = arith.addf %175, %177 : vector<8x128xf32>
    %179 = math.tanh %178 : vector<8x128xf32>
    %cst_42 = arith.constant 1.000000e+00 : f32
    %180 = vector.broadcast %cst_42 : f32 to vector<8x128xf32>
    %181 = arith.subf %180, %174 : vector<8x128xf32>
    %182 = arith.mulf %181, %179 : vector<8x128xf32>
    %183 = arith.mulf %174, %147 : vector<8x128xf32>
    %184 = arith.addf %182, %183 : vector<8x128xf32>
    %185 = arith.index_cast %c4_i32 : i32 to index
    %c0_43 = arith.constant 0 : index
    %c0_44 = arith.constant 0 : index
    %186 = vector.load %arg4[%185, %c0_43, %c0_44] : memref<8x8x128xf32, #tpu.memory_space<vmem>>, vector<1x8x128xf32>
    %187 = vector.shape_cast %186 : vector<1x8x128xf32> to vector<8x128xf32>
    %188 = vector.shape_cast %184 : vector<8x128xf32> to vector<1x8x128xf32>
    tpu.vector_store %arg4[%185, %c0_43, %c0_44], %188 {strides = array<i32>} : memref<8x8x128xf32, #tpu.memory_space<vmem>>, vector<1x8x128xf32>,
    %c5_i32 = arith.constant 5 : i32
    %189 = arith.index_cast %c5_i32 : i32 to index
    %c0_45 = arith.constant 0 : index
    %c0_46 = arith.constant 0 : index
    %190 = vector.load %arg0[%189, %c0_45, %c0_46] : memref<8x8x384xf32, #tpu.memory_space<vmem>>, vector<1x8x384xf32>
    %191 = vector.shape_cast %190 : vector<1x8x384xf32> to vector<8x384xf32>
    %192 = tpu.concatenate %184, %184 in 1 : vector<8x128xf32>, vector<8x128xf32> -> vector<8x256xf32>
    %193 = arith.mulf %192, %2 : vector<8x256xf32>
    %cst_47 = arith.constant dense<0.000000e+00> : vector<8x384xf32>
    %194 = tpu.matmul %193, %0, %cst_47 {dimension_numbers = #tpu.dot_dimension_numbers<[1], [0], [0], [1], [0, 0, 1, 1], [], []>} : vector<8x256xf32>, vector<256x384xf32>, vector<8x384xf32> -> vector<8x384xf32>
    %195 = arith.addf %194, %1 : vector<8x384xf32>
    %196 = vector.extract_strided_slice %191 {offsets = [0, 0], sizes = [8, 128], strides = [1, 1]} : vector<8x384xf32> to vector<8x128xf32>
    %197 = vector.extract_strided_slice %195 {offsets = [0, 0], sizes = [8, 128], strides = [1, 1]} : vector<8x384xf32> to vector<8x128xf32>
    %198 = arith.addf %196, %197 : vector<8x128xf32>
    %199 = arith.negf %198 : vector<8x128xf32>
    %200 = math.exp %199 : vector<8x128xf32>
    %cst_48 = arith.constant 1.000000e+00 : f32
    %201 = vector.broadcast %cst_48 : f32 to vector<8x128xf32>
    %202 = arith.addf %201, %200 : vector<8x128xf32>
    %203 = arith.divf %201, %202 : vector<8x128xf32>
    %204 = vector.extract_strided_slice %191 {offsets = [0, 128], sizes = [8, 128], strides = [1, 1]} : vector<8x384xf32> to vector<8x128xf32>
    %205 = vector.extract_strided_slice %195 {offsets = [0, 128], sizes = [8, 128], strides = [1, 1]} : vector<8x384xf32> to vector<8x128xf32>
    %206 = arith.addf %204, %205 : vector<8x128xf32>
    %207 = arith.negf %206 : vector<8x128xf32>
    %208 = math.exp %207 : vector<8x128xf32>
    %cst_49 = arith.constant 1.000000e+00 : f32
    %209 = vector.broadcast %cst_49 : f32 to vector<8x128xf32>
    %210 = arith.addf %209, %208 : vector<8x128xf32>
    %211 = arith.divf %209, %210 : vector<8x128xf32>
    %212 = vector.extract_strided_slice %191 {offsets = [0, 256], sizes = [8, 128], strides = [1, 1]} : vector<8x384xf32> to vector<8x128xf32>
    %213 = vector.extract_strided_slice %195 {offsets = [0, 256], sizes = [8, 128], strides = [1, 1]} : vector<8x384xf32> to vector<8x128xf32>
    %214 = arith.mulf %203, %213 : vector<8x128xf32>
    %215 = arith.addf %212, %214 : vector<8x128xf32>
    %216 = math.tanh %215 : vector<8x128xf32>
    %cst_50 = arith.constant 1.000000e+00 : f32
    %217 = vector.broadcast %cst_50 : f32 to vector<8x128xf32>
    %218 = arith.subf %217, %211 : vector<8x128xf32>
    %219 = arith.mulf %218, %216 : vector<8x128xf32>
    %220 = arith.mulf %211, %184 : vector<8x128xf32>
    %221 = arith.addf %219, %220 : vector<8x128xf32>
    %222 = arith.index_cast %c5_i32 : i32 to index
    %c0_51 = arith.constant 0 : index
    %c0_52 = arith.constant 0 : index
    %223 = vector.load %arg4[%222, %c0_51, %c0_52] : memref<8x8x128xf32, #tpu.memory_space<vmem>>, vector<1x8x128xf32>
    %224 = vector.shape_cast %223 : vector<1x8x128xf32> to vector<8x128xf32>
    %225 = vector.shape_cast %221 : vector<8x128xf32> to vector<1x8x128xf32>
    tpu.vector_store %arg4[%222, %c0_51, %c0_52], %225 {strides = array<i32>} : memref<8x8x128xf32, #tpu.memory_space<vmem>>, vector<1x8x128xf32>,
    %c6_i32 = arith.constant 6 : i32
    %226 = arith.index_cast %c6_i32 : i32 to index
    %c0_53 = arith.constant 0 : index
    %c0_54 = arith.constant 0 : index
    %227 = vector.load %arg0[%226, %c0_53, %c0_54] : memref<8x8x384xf32, #tpu.memory_space<vmem>>, vector<1x8x384xf32>
    %228 = vector.shape_cast %227 : vector<1x8x384xf32> to vector<8x384xf32>
    %229 = tpu.concatenate %221, %221 in 1 : vector<8x128xf32>, vector<8x128xf32> -> vector<8x256xf32>
    %230 = arith.mulf %229, %2 : vector<8x256xf32>
    %cst_55 = arith.constant dense<0.000000e+00> : vector<8x384xf32>
    %231 = tpu.matmul %230, %0, %cst_55 {dimension_numbers = #tpu.dot_dimension_numbers<[1], [0], [0], [1], [0, 0, 1, 1], [], []>} : vector<8x256xf32>, vector<256x384xf32>, vector<8x384xf32> -> vector<8x384xf32>
    %232 = arith.addf %231, %1 : vector<8x384xf32>
    %233 = vector.extract_strided_slice %228 {offsets = [0, 0], sizes = [8, 128], strides = [1, 1]} : vector<8x384xf32> to vector<8x128xf32>
    %234 = vector.extract_strided_slice %232 {offsets = [0, 0], sizes = [8, 128], strides = [1, 1]} : vector<8x384xf32> to vector<8x128xf32>
    %235 = arith.addf %233, %234 : vector<8x128xf32>
    %236 = arith.negf %235 : vector<8x128xf32>
    %237 = math.exp %236 : vector<8x128xf32>
    %cst_56 = arith.constant 1.000000e+00 : f32
    %238 = vector.broadcast %cst_56 : f32 to vector<8x128xf32>
    %239 = arith.addf %238, %237 : vector<8x128xf32>
    %240 = arith.divf %238, %239 : vector<8x128xf32>
    %241 = vector.extract_strided_slice %228 {offsets = [0, 128], sizes = [8, 128], strides = [1, 1]} : vector<8x384xf32> to vector<8x128xf32>
    %242 = vector.extract_strided_slice %232 {offsets = [0, 128], sizes = [8, 128], strides = [1, 1]} : vector<8x384xf32> to vector<8x128xf32>
    %243 = arith.addf %241, %242 : vector<8x128xf32>
    %244 = arith.negf %243 : vector<8x128xf32>
    %245 = math.exp %244 : vector<8x128xf32>
    %cst_57 = arith.constant 1.000000e+00 : f32
    %246 = vector.broadcast %cst_57 : f32 to vector<8x128xf32>
    %247 = arith.addf %246, %245 : vector<8x128xf32>
    %248 = arith.divf %246, %247 : vector<8x128xf32>
    %249 = vector.extract_strided_slice %228 {offsets = [0, 256], sizes = [8, 128], strides = [1, 1]} : vector<8x384xf32> to vector<8x128xf32>
    %250 = vector.extract_strided_slice %232 {offsets = [0, 256], sizes = [8, 128], strides = [1, 1]} : vector<8x384xf32> to vector<8x128xf32>
    %251 = arith.mulf %240, %250 : vector<8x128xf32>
    %252 = arith.addf %249, %251 : vector<8x128xf32>
    %253 = math.tanh %252 : vector<8x128xf32>
    %cst_58 = arith.constant 1.000000e+00 : f32
    %254 = vector.broadcast %cst_58 : f32 to vector<8x128xf32>
    %255 = arith.subf %254, %248 : vector<8x128xf32>
    %256 = arith.mulf %255, %253 : vector<8x128xf32>
    %257 = arith.mulf %248, %221 : vector<8x128xf32>
    %258 = arith.addf %256, %257 : vector<8x128xf32>
    %259 = arith.index_cast %c6_i32 : i32 to index
    %c0_59 = arith.constant 0 : index
    %c0_60 = arith.constant 0 : index
    %260 = vector.load %arg4[%259, %c0_59, %c0_60] : memref<8x8x128xf32, #tpu.memory_space<vmem>>, vector<1x8x128xf32>
    %261 = vector.shape_cast %260 : vector<1x8x128xf32> to vector<8x128xf32>
    %262 = vector.shape_cast %258 : vector<8x128xf32> to vector<1x8x128xf32>
    tpu.vector_store %arg4[%259, %c0_59, %c0_60], %262 {strides = array<i32>} : memref<8x8x128xf32, #tpu.memory_space<vmem>>, vector<1x8x128xf32>,
    %c7_i32 = arith.constant 7 : i32
    %263 = arith.index_cast %c7_i32 : i32 to index
    %c0_61 = arith.constant 0 : index
    %c0_62 = arith.constant 0 : index
    %264 = vector.load %arg0[%263, %c0_61, %c0_62] : memref<8x8x384xf32, #tpu.memory_space<vmem>>, vector<1x8x384xf32>
    %265 = vector.shape_cast %264 : vector<1x8x384xf32> to vector<8x384xf32>
    %266 = tpu.concatenate %258, %258 in 1 : vector<8x128xf32>, vector<8x128xf32> -> vector<8x256xf32>
    %267 = arith.mulf %266, %2 : vector<8x256xf32>
    %cst_63 = arith.constant dense<0.000000e+00> : vector<8x384xf32>
    %268 = tpu.matmul %267, %0, %cst_63 {dimension_numbers = #tpu.dot_dimension_numbers<[1], [0], [0], [1], [0, 0, 1, 1], [], []>} : vector<8x256xf32>, vector<256x384xf32>, vector<8x384xf32> -> vector<8x384xf32>
    %269 = arith.addf %268, %1 : vector<8x384xf32>
    %270 = vector.extract_strided_slice %265 {offsets = [0, 0], sizes = [8, 128], strides = [1, 1]} : vector<8x384xf32> to vector<8x128xf32>
    %271 = vector.extract_strided_slice %269 {offsets = [0, 0], sizes = [8, 128], strides = [1, 1]} : vector<8x384xf32> to vector<8x128xf32>
    %272 = arith.addf %270, %271 : vector<8x128xf32>
    %273 = arith.negf %272 : vector<8x128xf32>
    %274 = math.exp %273 : vector<8x128xf32>
    %cst_64 = arith.constant 1.000000e+00 : f32
    %275 = vector.broadcast %cst_64 : f32 to vector<8x128xf32>
    %276 = arith.addf %275, %274 : vector<8x128xf32>
    %277 = arith.divf %275, %276 : vector<8x128xf32>
    %278 = vector.extract_strided_slice %265 {offsets = [0, 128], sizes = [8, 128], strides = [1, 1]} : vector<8x384xf32> to vector<8x128xf32>
    %279 = vector.extract_strided_slice %269 {offsets = [0, 128], sizes = [8, 128], strides = [1, 1]} : vector<8x384xf32> to vector<8x128xf32>
    %280 = arith.addf %278, %279 : vector<8x128xf32>
    %281 = arith.negf %280 : vector<8x128xf32>
    %282 = math.exp %281 : vector<8x128xf32>
    %cst_65 = arith.constant 1.000000e+00 : f32
    %283 = vector.broadcast %cst_65 : f32 to vector<8x128xf32>
    %284 = arith.addf %283, %282 : vector<8x128xf32>
    %285 = arith.divf %283, %284 : vector<8x128xf32>
    %286 = vector.extract_strided_slice %265 {offsets = [0, 256], sizes = [8, 128], strides = [1, 1]} : vector<8x384xf32> to vector<8x128xf32>
    %287 = vector.extract_strided_slice %269 {offsets = [0, 256], sizes = [8, 128], strides = [1, 1]} : vector<8x384xf32> to vector<8x128xf32>
    %288 = arith.mulf %277, %287 : vector<8x128xf32>
    %289 = arith.addf %286, %288 : vector<8x128xf32>
    %290 = math.tanh %289 : vector<8x128xf32>
    %cst_66 = arith.constant 1.000000e+00 : f32
    %291 = vector.broadcast %cst_66 : f32 to vector<8x128xf32>
    %292 = arith.subf %291, %285 : vector<8x128xf32>
    %293 = arith.mulf %292, %290 : vector<8x128xf32>
    %294 = arith.mulf %285, %258 : vector<8x128xf32>
    %295 = arith.addf %293, %294 : vector<8x128xf32>
    %296 = arith.index_cast %c7_i32 : i32 to index
    %c0_67 = arith.constant 0 : index
    %c0_68 = arith.constant 0 : index
    %297 = vector.load %arg4[%296, %c0_67, %c0_68] : memref<8x8x128xf32, #tpu.memory_space<vmem>>, vector<1x8x128xf32>
    %298 = vector.shape_cast %297 : vector<1x8x128xf32> to vector<8x128xf32>
    %299 = vector.shape_cast %295 : vector<8x128xf32> to vector<1x8x128xf32>
    tpu.vector_store %arg4[%296, %c0_67, %c0_68], %299 {strides = array<i32>} : memref<8x8x128xf32, #tpu.memory_space<vmem>>, vector<1x8x128xf32>,
    %c8_i32 = arith.constant 8 : i32
    return
  }
}

</mosaic_0001>

<bundles_post_ra>
// kernel: gru_layer.1
= control target key start
LH: loop header
LB: loop body
LE: loop exit
PB: predicated region body
PF: predicated region fallthrough
CT: control target
= control target key end

     0   :  { %s3660_s1 = inlined_call_operand.vmem [shape: f32[256,384], index: 1, kind: input, shape index: {}]   ;;  %s3661_s3 = inlined_call_operand.vmem [shape: f32[8,256], index: 3, kind: input, shape index: {}]   ;;  %s3662_s2 = inlined_call_operand.vmem [shape: f32[8,384], index: 2, kind: input, shape index: {}]   ;;  %s3663_s0 = inlined_call_operand.vmem [shape: f32[8,8,384], index: 0, kind: input, shape index: {}]   ;;  %s3664_s4 = inlined_call_operand.vmem [shape: f32[8,8,128], index: 4, kind: output, shape index: {}]  }
   0x1   :  { %v18_v0 = vld [vmem:[%s3660_s1 + $0x8] sm:$0xff]  ;;  %v21_v1 = vld [vmem:[%s3660_s1 + $0x20] sm:$0xff]  ;;  %v20_v4 = vld [vmem:[%s3660_s1 + $0x18] sm:$0xff] }
   0x2   :  { %v17_v2 = vld [vmem:[%s3660_s1] sm:$0xff]  ;;  %v2691_v3 = vpack.c.bf16 %v21_v1, %v18_v0  ;;  %v24_v5 = vld [vmem:[%s3660_s1 + $0x38] sm:$0xff]  ;;  %v27_v6 = vld [vmem:[%s3660_s1 + $0x50] sm:$0xff] }
   0x3   :  { %v2702_v7 = vpack.c.bf16 %v20_v4, %v17_v2  ;;  %v2704_v8 = vpack.c.bf16 %v27_v6, %v24_v5  ;;  %v23_v9 = vld [vmem:[%s3660_s1 + $0x30] sm:$0xff]  ;;  %v26_v10 = vld [vmem:[%s3660_s1 + $0x48] sm:$0xff]  ;;  %v33_v12 = vld [vmem:[%s3660_s1 + $0x80] sm:$0xff] }
   0x4   :  { %v30_v11 = vld [vmem:[%s3660_s1 + $0x68] sm:$0xff]  ;;  %1805 = vmatprep.subr.bf16.mxu0 %v2691_v3  ;;  %v2720_v13 = vpack.c.bf16 %v26_v10, %v23_v9  ;;  %v29_v15 = vld [vmem:[%s3660_s1 + $0x60] sm:$0xff]  ;;  %v32_v16 = vld [vmem:[%s3660_s1 + $0x78] sm:$0xff] }
   0x5   :  { %1807 = vmatpush1.bf16.msra.mxu0 %v2702_v7  ;;  %v2723_v14 = vpack.c.bf16 %v33_v12, %v30_v11  ;;  %v36_v17 = vld [vmem:[%s3660_s1 + $0x98] sm:$0xff]  ;;  %v39_v18 = vld [vmem:[%s3660_s1 + $0xb0] sm:$0xff]  ;;  %v2738_v19 = vpack.c.bf16 %v32_v16, %v29_v15  ;;  %v38_v22 = vld [vmem:[%s3660_s1 + $0xa8] sm:$0xff] }
   0x6   :  { %1809 = vmatprep.subr.bf16.mxu0 %v2704_v8  ;;  %v2741_v20 = vpack.c.bf16 %v39_v18, %v36_v17  ;;  %v35_v21 = vld [vmem:[%s3660_s1 + $0x90] sm:$0xff]  ;;  %v42_v23 = vld [vmem:[%s3660_s1 + $0xc8] sm:$0xff]  ;;  %v45_v24 = vld [vmem:[%s3660_s1 + $0xe0] sm:$0xff] }
   0x7   :  { %v2756_v25 = vpack.c.bf16 %v38_v22, %v35_v21  ;;  %v2759_v26 = vpack.c.bf16 %v45_v24, %v42_v23  ;;  %v41_v27 = vld [vmem:[%s3660_s1 + $0xc0] sm:$0xff]  ;;  %v44_v28 = vld [vmem:[%s3660_s1 + $0xd8] sm:$0xff]  ;;  %v51_v30 = vld [vmem:[%s3660_s1 + $0x110] sm:$0xff] }
   0x8   :  { %v48_v29 = vld [vmem:[%s3660_s1 + $0xf8] sm:$0xff]  ;;  %v2774_v31 = vpack.c.bf16 %v44_v28, %v41_v27  ;;  %v47_v33 = vld [vmem:[%s3660_s1 + $0xf0] sm:$0xff]  ;;  %v50_v34 = vld [vmem:[%s3660_s1 + $0x108] sm:$0xff] }
   0x9   :  { %1811 = vmatpush1.bf16.msra.mxu0 %v2720_v13  ;;  %v2777_v32 = vpack.c.bf16 %v51_v30, %v48_v29  ;;  %v54_v35 = vld [vmem:[%s3660_s1 + $0x128] sm:$0xff]  ;;  %v57_v36 = vld [vmem:[%s3660_s1 + $0x140] sm:$0xff]  ;;  %v67_v37 = vld [vmem:[%s3660_s1 + $0x190] sm:$0xff]  ;;  %v2798_v39 = vpack.c.bf16 %v50_v34, %v47_v33 }
   0xa   :  { %1813 = vmatprep.subr.bf16.mxu0 %v2723_v14  ;;  %v70_v38 = vld [vmem:[%s3660_s1 + $0x1a8] sm:$0xff]  ;;  %v53_v40 = vld [vmem:[%s3660_s1 + $0x120] sm:$0xff]  ;;  %v19_v42 = vld [vmem:[%s3660_s1 + $0x10] sm:$0xff]  ;;  %v2809_v43 = vpack.c.bf16 %v57_v36, %v54_v35 }
   0xb   :  { %v2803_v41 = vpack.c.bf16 %v70_v38, %v67_v37  ;;  %v56_v44 = vld [vmem:[%s3660_s1 + $0x138] sm:$0xff]  ;;  %v22_v46 = vld [vmem:[%s3660_s1 + $0x28] sm:$0xff]  ;;  %v63_v47 = vld [vmem:[%s3660_s1 + $0x170] sm:$0xff] }
   0xc   :  { %v60_v45 = vld [vmem:[%s3660_s1 + $0x158] sm:$0xff]  ;;  %v2824_v48 = vpack.c.bf16 %v22_v46, %v19_v42  ;;  %v73_v49 = vld [vmem:[%s3660_s1 + $0x1c0] sm:$0xff]  ;;  %v59_v51 = vld [vmem:[%s3660_s1 + $0x150] sm:$0xff]  ;;  %v2847_v56 = vpack.c.bf16 %v56_v44, %v53_v40 }
   0xd   :  { %1815 = vmatpush1.bf16.msra.mxu0 %v2738_v19  ;;  %3683 = vst [vmem:[#allocation2_spill] sm:$0xff] %v2803_v41  ;;  %1869 = vmatprep.subr.bf16.mxu1 %v2803_v41  ;;  %v76_v50 = vld [vmem:[%s3660_s1 + $0x1d8] sm:$0xff]  ;;  %v62_v52 = vld [vmem:[%s3660_s1 + $0x168] sm:$0xff]  ;;  %v25_v54 = vld [vmem:[%s3660_s1 + $0x40] sm:$0xff]  ;;  %v2864_v61 = vpack.c.bf16 %v63_v47, %v60_v45 }
   0xe   :  { %1817 = vmatprep.subr.bf16.mxu0 %v2741_v20  ;;  %v2838_v53 = vpack.c.bf16 %v76_v50, %v73_v49  ;;  %v28_v55 = vld [vmem:[%s3660_s1 + $0x58] sm:$0xff]  ;;  %v66_v57 = vld [vmem:[%s3660_s1 + $0x188] sm:$0xff]  ;;  %1871 = vmatpush3.bf16.msra.mxu1 %v2824_v48  ;;  %v79_v60 = vld [vmem:[%s3660_s1 + $0x1f0] sm:$0xff]  ;;  %v2889_v9 = vpack.c.bf16 %v62_v52, %v59_v51 }
   0xf   :  { %v2853_v58 = vpack.c.bf16 %v28_v55, %v25_v54  ;;  %v2858_v59 = vld [vmem:[%s3661_s3 + $0x8] sm:$0xff]  ;;  %v31_v0 = vld [vmem:[%s3660_s1 + $0x70] sm:$0xff]  ;;  %v69_v2 = vld [vmem:[%s3660_s1 + $0x1a0] sm:$0xff] }
  0x10   :  { %1873 = vmatprep.subr.bf16.mxu1 %v2838_v53  ;;  %v122_v62 = vmul.f32 0.0, %v2858_v59  ;;  %v82_v63 = vld [vmem:[%s3660_s1 + $0x208] sm:$0xff]  ;;  %v85_v5 = vld [vmem:[%s3660_s1 + $0x220] sm:$0xff]  ;;  %v88_v6 = vld [vmem:[%s3660_s1 + $0x238] sm:$0xff]  ;;  %v2901_v15 = vpack.c.bf16 %v69_v2, %v66_v57 }
  0x11   :  { %1819 = vmatpush1.bf16.msra.mxu0 %v2756_v25  ;;  %v34_v1 = vld [vmem:[%s3660_s1 + $0x88] sm:$0xff]  ;;  %v2880_v4 = vpack.c.bf16 %v82_v63, %v79_v60  ;;  %v65_v10 = vld [vmem:[%s3660_s1 + $0x180] sm:$0xff]  ;;  %v68_v11 = vld [vmem:[%s3660_s1 + $0x198] sm:$0xff]  ;;  %v2907_v17 = vpack.c.bf16 %v88_v6, %v85_v5 }
  0x12   :  { %1821 = vmatprep.subr.bf16.mxu0 %v2759_v26  ;;  %187 = vmatprep.mubr.f32.mxu0 %v122_v62  ;;  %v2898_v12 = vpack.c.bf16 %v34_v1, %v31_v0  ;;  %v72_v16 = vld [vmem:[%s3660_s1 + $0x1b8] sm:$0xff]  ;;  %v37_v18 = vld [vmem:[%s3660_s1 + $0xa0] sm:$0xff]  ;;  %v75_v22 = vld [vmem:[%s3660_s1 + $0x1d0] sm:$0xff]  ;;  %v2925_v27 = vpack.c.bf16 %v68_v11, %v65_v10 }
  0x13   :  { %258 = vmatprep.mubr.f32.mxu1 %v122_v62  ;;  %1875 = vmatpush3.bf16.msra.mxu1 %v2853_v58  ;;  %v40_v21 = vld [vmem:[%s3660_s1 + $0xb8] sm:$0xff]  ;;  %v91_v23 = vld [vmem:[%s3660_s1 + $0x250] sm:$0xff]  ;;  %v94_v24 = vld [vmem:[%s3660_s1 + $0x268] sm:$0xff]  ;;  %v2937_v33 = vpack.c.bf16 %v75_v22, %v72_v16 }
  0x14   :  { %1877 = vmatprep.subr.bf16.mxu1 %v2880_v4  ;;  %v71_v28 = vld [vmem:[%s3660_s1 + $0x1b0] sm:$0xff]  ;;  %v74_v29 = vld [vmem:[%s3660_s1 + $0x1c8] sm:$0xff]  ;;  %v2934_v30 = vpack.c.bf16 %v40_v21, %v37_v18  ;;  %v2943_v35 = vpack.c.bf16 %v94_v24, %v91_v23  ;;  %v81_v38 = vld [vmem:[%s3660_s1 + $0x200] sm:$0xff] }
  0x15   :  { %1823 = vmatpush1.bf16.msra.mxu0 %v2774_v31  ;;  %v78_v34 = vld [vmem:[%s3660_s1 + $0x1e8] sm:$0xff]  ;;  %v43_v36 = vld [vmem:[%s3660_s1 + $0xd0] sm:$0xff]  ;;  %v97_v40 = vld [vmem:[%s3660_s1 + $0x280] sm:$0xff]  ;;  %v2961_v44 = vpack.c.bf16 %v74_v29, %v71_v28 }
  0x16   :  { %1825 = vmatprep.subr.bf16.mxu0 %v2777_v32  ;;  %v46_v37 = vld [vmem:[%s3660_s1 + $0xe8] sm:$0xff]  ;;  %v100_v42 = vld [vmem:[%s3660_s1 + $0x298] sm:$0xff]  ;;  %v77_v45 = vld [vmem:[%s3660_s1 + $0x1e0] sm:$0xff]  ;;  %v2973_v49 = vpack.c.bf16 %v81_v38, %v78_v34 }
  0x17   :  { %1879 = vmatpush3.bf16.msra.mxu1 %v2898_v12  ;;  %v80_v46 = vld [vmem:[%s3660_s1 + $0x1f8] sm:$0xff]  ;;  %v2970_v47 = vpack.c.bf16 %v46_v37, %v43_v36  ;;  %v2979_v51 = vpack.c.bf16 %v100_v42, %v97_v40  ;;  %v49_v52 = vld [vmem:[%s3660_s1 + $0x100] sm:$0xff]  ;;  %v87_v55 = vld [vmem:[%s3660_s1 + $0x230] sm:$0xff] }
  0x18   :  { %1881 = vmatprep.subr.bf16.mxu1 %v2907_v17  ;;  %v84_v50 = vld [vmem:[%s3660_s1 + $0x218] sm:$0xff]  ;;  %v103_v57 = vld [vmem:[%s3660_s1 + $0x2b0] sm:$0xff]  ;;  %v106_v60 = vld [vmem:[%s3660_s1 + $0x2c8] sm:$0xff]  ;;  %v2997_v62 = vpack.c.bf16 %v80_v46, %v77_v45 }
  0x19   :  { %1827 = vmatpush1.bf16.msra.mxu0 %v2798_v39  ;;  %v52_v54 = vld [vmem:[%s3660_s1 + $0x118] sm:$0xff]  ;;  %v83_v63 = vld [vmem:[%s3660_s1 + $0x210] sm:$0xff]  ;;  %v86_v0 = vld [vmem:[%s3660_s1 + $0x228] sm:$0xff]  ;;  %v3009_v2 = vpack.c.bf16 %v87_v55, %v84_v50  ;;  %v3015_v6 = vpack.c.bf16 %v106_v60, %v103_v57 }
  0x1a   :  { %1829 = vmatprep.subr.bf16.mxu0 %v2809_v43  ;;  %v3006_v1 = vpack.c.bf16 %v52_v54, %v49_v52  ;;  %v90_v5 = vld [vmem:[%s3660_s1 + $0x248] sm:$0xff]  ;;  %v55_v10 = vld [vmem:[%s3660_s1 + $0x130] sm:$0xff]  ;;  %v93_v16 = vld [vmem:[%s3660_s1 + $0x260] sm:$0xff]  ;;  %v3033_v22 = vpack.c.bf16 %v86_v0, %v83_v63 }
  0x1b   :  { %1883 = vmatpush3.bf16.msra.mxu1 %v2934_v30  ;;  %v58_v11 = vld [vmem:[%s3660_s1 + $0x148] sm:$0xff]  ;;  %v109_v18 = vld [vmem:[%s3660_s1 + $0x2e0] sm:$0xff]  ;;  %v112_v21 = vld [vmem:[%s3660_s1 + $0x2f8] sm:$0xff]  ;;  %v3042_v28 = vpack.c.bf16 %v93_v16, %v90_v5 }
  0x1c   :  { %1885 = vmatprep.subr.bf16.mxu1 %v2943_v35  ;;  %v89_v23 = vld [vmem:[%s3660_s1 + $0x240] sm:$0xff]  ;;  %v3039_v24 = vpack.c.bf16 %v58_v11, %v55_v10  ;;  %v92_v29 = vld [vmem:[%s3660_s1 + $0x258] sm:$0xff]  ;;  %v3048_v34 = vpack.c.bf16 %v112_v21, %v109_v18  ;;  %v99_v40 = vld [vmem:[%s3660_s1 + $0x290] sm:$0xff] }
  0x1d   :  { %1831 = vmatpush1.bf16.msra.mxu0 %v2847_v56  ;;  %v61_v36 = vld [vmem:[%s3660_s1 + $0x160] sm:$0xff]  ;;  %v64_v37 = vld [vmem:[%s3660_s1 + $0x178] sm:$0xff]  ;;  %v3063_v42 = vpack.c.bf16 %v92_v29, %v89_v23  ;;  %v95_v50 = vld [vmem:[%s3660_s1 + $0x270] sm:$0xff] }
  0x1e   :  { %1833 = vmatprep.subr.bf16.mxu0 %v2864_v61  ;;  %v96_v38 = vld [vmem:[%s3660_s1 + $0x278] sm:$0xff]  ;;  %v3066_v45 = vpack.c.bf16 %v64_v37, %v61_v36  ;;  %v98_v52 = vld [vmem:[%s3660_s1 + $0x288] sm:$0xff]  ;;  %v105_v55 = vld [vmem:[%s3660_s1 + $0x2c0] sm:$0xff] }
  0x1f   :  { %1887 = vmatpush3.bf16.msra.mxu1 %v2970_v47  ;;  %v3069_v46 = vpack.c.bf16 %v99_v40, %v96_v38  ;;  %v102_v54 = vld [vmem:[%s3660_s1 + $0x2a8] sm:$0xff]  ;;  %v3087_v57 = vld [vmem:[%s3661_s3] sm:$0xff]  ;;  %v3090_v60 = vpack.c.bf16 %v98_v52, %v95_v50  ;;  %v104_v5 = vld [vmem:[%s3660_s1 + $0x2b8] sm:$0xff] }
  0x20   :  { %1889 = vmatprep.subr.bf16.mxu1 %v2979_v51  ;;  %v3094_v63 = vpack.c.bf16 %v105_v55, %v102_v54  ;;  %v101_v0 = vld [vmem:[%s3660_s1 + $0x2a0] sm:$0xff]  ;;  %v121_v10 = vmul.f32 0.0, %v3087_v57  ;;  %v108_v11 = vld [vmem:[%s3660_s1 + $0x2d8] sm:$0xff]  ;;  %v111_v16 = vld [vmem:[%s3660_s1 + $0x2f0] sm:$0xff] }
  0x21   :  { %1835 = vmatpush1.bf16.msra.mxu0 %v2889_v9  ;;  %3684 = vst [vmem:[#allocation3_spill] sm:$0xff] %v3069_v46  ;;  %3685 = vst [vmem:[#allocation4_spill] sm:$0xff] %v3090_v60  ;;  %v3111_v18 = vpack.c.bf16 %v104_v5, %v101_v0  ;;  %v3115_v21 = vpack.c.bf16 %v111_v16, %v108_v11  ;;  %v107_v23 = vld [vmem:[%s3660_s1 + $0x2d0] sm:$0xff]  ;;  %v110_v29 = vld [vmem:[%s3660_s1 + $0x2e8] sm:$0xff] }
  0x22   :  { %1837 = vmatprep.subr.bf16.mxu0 %v2901_v15  ;;  %3686 = vst [vmem:[#allocation5_spill] sm:$0xff] %v3094_v63  ;;  %v3125_v36 = vpack.c.bf16 %v110_v29, %v107_v23  ;;  %v3179_v50 = vld [vmem:[%s3662_s2] sm:$0xff]  ;;  %v3184_v52 = vld [vmem:[%s3662_s2 + $0x8] sm:$0xff] }
  0x23   :  { %1891 = vmatpush3.bf16.msra.mxu1 %v3006_v1  ;;  %3687 = vst [vmem:[#allocation6_spill] sm:$0xff] %v3111_v18  ;;  %3688 = vst [vmem:[#allocation7_spill] sm:$0xff] %v3115_v21  ;;  %v118_v54 = vld [vmem:[%s3663_s0] sm:$0xff]  ;;  %v119_v16 = vld [vmem:[%s3663_s0 + $0x8] sm:$0xff] }
  0x24   :  { %1893 = vmatprep.subr.bf16.mxu1 %v3015_v6  ;;  %3689 = vst [vmem:[#allocation8_spill] sm:$0xff] %v3125_v36  ;;  %3690 = vst [vmem:[#allocation9_spill] sm:$0xff] %v3179_v50 }
  0x25   :  { %1839 = vmatpush1.bf16.msra.mxu0 %v2925_v27  ;;  %3691 = vst [vmem:[#allocation10_spill] sm:$0xff] %v3184_v52 }
  0x26   :  { %1841 = vmatprep.subr.bf16.mxu0 %v2937_v33 }
  0x27   :  { %1895 = vmatpush3.bf16.msra.mxu1 %v3039_v24 }
  0x28   :  { %1897 = vmatprep.subr.bf16.mxu1 %v3048_v34 }
  0x29   :  { %1843 = vmatpush1.bf16.msra.mxu0 %v2961_v44 }
  0x2a   :  { %1845 = vmatprep.subr.bf16.mxu0 %v2973_v49 }
  0x2b   :  { %1899 = vmatpush3.bf16.msra.mxu1 %v3066_v45 }
  0x2c   :  { %1901 = vmatprep.subr.bf16.mxu1 %v2691_v3 }
  0x2d   :  { %1847 = vmatpush1.bf16.msra.mxu0 %v2997_v62 }
  0x2e   :  { %1849 = vmatprep.subr.bf16.mxu0 %v3009_v2  ;;  %259 = vmatmul.mubr.f32.vlgmr.msra.gmra.mrb[0].mxu1 %v121_v10 }
  0x2f   :  { %1903 = vmatpush1.bf16.msra.mxu1 %v2702_v7 }
  0x30   :  { %1905 = vmatprep.subr.bf16.mxu1 %v2704_v8 }
  0x31   :  { %1851 = vmatpush1.bf16.msra.mxu0 %v3033_v22 }
  0x32   :  { %1853 = vmatprep.subr.bf16.mxu0 %v3042_v28 }
  0x33   :  { %1907 = vmatpush1.bf16.msra.mxu1 %v2720_v13 }
  0x34   :  { %1909 = vmatprep.subr.bf16.mxu1 %v2723_v14 }
  0x35   :  { %1855 = vmatpush1.bf16.msra.mxu0 %v3063_v42 }
  0x36   :  { %1857 = vmatprep.subr.bf16.mxu0 %v3069_v46 }
  0x37   :  { %1911 = vmatpush1.bf16.msra.mxu1 %v2738_v19 }
  0x38   :  { %1913 = vmatprep.subr.bf16.mxu1 %v2741_v20 }
  0x39   :  { %1859 = vmatpush1.bf16.msra.mxu0 %v3090_v60 }
  0x3a   :  { %1861 = vmatprep.subr.bf16.mxu0 %v3094_v63 }
  0x3b   :  { %1915 = vmatpush1.bf16.msra.mxu1 %v2756_v25 }
  0x3c   :  { %1917 = vmatprep.subr.bf16.mxu1 %v2759_v26 }
  0x3d   :  { %1863 = vmatpush1.bf16.msra.mxu0 %v3111_v18 }
  0x3e   :  { %1865 = vmatprep.subr.bf16.mxu0 %v3115_v21 }
  0x3f   :  { %1919 = vmatpush1.bf16.msra.mxu1 %v2774_v31 }
  0x40   :  { %1921 = vmatprep.subr.bf16.mxu1 %v2777_v32 }
  0x41   :  { %1867 = vmatpush1.bf16.msra.mxu0 %v3125_v36 }
  0x42   :  { %1965 = vmatprep.subr.bf16.mxu0 %v2803_v41 }
  0x43   :  { %1923 = vmatpush1.bf16.msra.mxu1 %v2798_v39 }
  0x44   :  { %188 = vmatmul.mubr.f32.vlgmr.msra.gmra.mrb[0].mxu0 %v121_v10  ;;  %1925 = vmatprep.subr.bf16.mxu1 %v2809_v43 }
  0x45   :  { %1967 = vmatpush3.bf16.msra.mxu0 %v2824_v48 }
  0x46   :  { %1969 = vmatprep.subr.bf16.mxu0 %v2838_v53 }
  0x47   :  { %1927 = vmatpush1.bf16.msra.mxu1 %v2847_v56 }
  0x48   :  { %1929 = vmatprep.subr.bf16.mxu1 %v2864_v61 }
  0x49   :  { %1971 = vmatpush3.bf16.msra.mxu0 %v2853_v58 }
  0x4a   :  { %1973 = vmatprep.subr.bf16.mxu0 %v2880_v4 }
  0x4b   :  { %1931 = vmatpush1.bf16.msra.mxu1 %v2889_v9 }
  0x4c   :  { %1933 = vmatprep.subr.bf16.mxu1 %v2901_v15 }
  0x4d   :  { %1975 = vmatpush3.bf16.msra.mxu0 %v2898_v12 }
  0x4e   :  { %1977 = vmatprep.subr.bf16.mxu0 %v2907_v17 }
  0x4f   :  { %1935 = vmatpush1.bf16.msra.mxu1 %v2925_v27 }
  0x50   :  { %1937 = vmatprep.subr.bf16.mxu1 %v2937_v33 }
  0x51   :  { %1979 = vmatpush3.bf16.msra.mxu0 %v2934_v30 }
  0x52   :  { %1981 = vmatprep.subr.bf16.mxu0 %v2943_v35 }
  0x53   :  { %1939 = vmatpush1.bf16.msra.mxu1 %v2961_v44 }
  0x54   :  { %1941 = vmatprep.subr.bf16.mxu1 %v2973_v49 }
  0x55   :  { %1983 = vmatpush3.bf16.msra.mxu0 %v2970_v47 }
  0x56   :  { %1985 = vmatprep.subr.bf16.mxu0 %v2979_v51 }
  0x57   :  { %1943 = vmatpush1.bf16.msra.mxu1 %v2997_v62 }
  0x58   :  { %1945 = vmatprep.subr.bf16.mxu1 %v3009_v2 }
  0x59   :  { %1987 = vmatpush3.bf16.msra.mxu0 %v3006_v1 }
  0x5a   :  { %1989 = vmatprep.subr.bf16.mxu0 %v3015_v6 }
  0x5b   :  { %1947 = vmatpush1.bf16.msra.mxu1 %v3033_v22 }
  0x5c   :  { %1949 = vmatprep.subr.bf16.mxu1 %v3042_v28 }
  0x5d   :  { %1991 = vmatpush3.bf16.msra.mxu0 %v3039_v24 }
  0x5e   :  { %1993 = vmatprep.subr.bf16.mxu0 %v3048_v34 }
  0x5f   :  { %1951 = vmatpush1.bf16.msra.mxu1 %v3063_v42 }
  0x60   :  { %1953 = vmatprep.subr.bf16.mxu1 %v3069_v46 }
  0x61   :  { %1995 = vmatpush3.bf16.msra.mxu0 %v3066_v45 }
  0x62   :  { %1997 = vmatprep.subr.bf16.mxu0 %v2691_v3 }
  0x63   :  { %1955 = vmatpush1.bf16.msra.mxu1 %v3090_v60 }
  0x64   :  { %1957 = vmatprep.subr.bf16.mxu1 %v3094_v63 }
  0x67   :  { %1959 = vmatpush1.bf16.msra.mxu1 %v3111_v18 }
  0x68   :  { %1961 = vmatprep.subr.bf16.mxu1 %v3115_v21 }
  0x6b   :  { %1963 = vmatpush1.bf16.msra.mxu1 %v3125_v36 }
  0x6c   :  { %2061 = vmatprep.subr.bf16.mxu1 %v2803_v41 }
 0x101   :  { %v1556_v37 = vpop.f32.mrb[0].mxu1 }
 0x102   :  { %v1557_v38 = vpop.f32.mrb[1].mxu1 }
 0x103   :  { %v1558_v40 = vadd.f32 %v1557_v38, %v1556_v37 }
 0x117   :  { %v189_v55 = vpop.f32.mrb[0].mxu0 }
 0x118   :  { %v190_v0 = vadd.f32 %v189_v55, %v3179_v50  ;;  %v191_v5 = vpop.f32.mrb[1].mxu0  ;;  %v3197_v55 = vld [vmem:[%s3662_s2 + $0x10] sm:$0xff] }
 0x119   :  { %v192_v10 = vadd.f32 %v191_v5, %v3184_v52 }
 0x11a   :  { %v264_v11 = vadd.f32 %v190_v0, %v118_v54  ;;  %v261_v54 = vadd.f32 %v1558_v40, %v3197_v55 }
 0x11b   :  { %v271_v29 = vadd.f32 %v192_v10, %v119_v16  ;;  %v120_v10 = vld [vmem:[%s3663_s0 + $0x10] sm:$0xff] }
 0x11c   :  { %v1480_v23 = vmul.f32 -1.442695, %v264_v11 }
 0x11d   :  { %v1481_v37 = vmul.f32 -1.442695, %v271_v29 }
 0x11e   :  { %2572 = vpow2.f32 %v1480_v23 }
 0x11f   :  { %2574 = vpow2.f32 %v1481_v37 }
 0x128   :  { %v2573_v38 = vpop.eup %2572 }
 0x129   :  { %v268_v41 = vadd.f32 1.0, %v2573_v38  ;;  %v2575_v36 = vpop.eup %2574 }
 0x12a   :  { %v275_v5 = vadd.f32 1.0, %v2575_v36 }
 0x12b   :  { %2576 = vrcp.f32 %v268_v41 }
 0x12c   :  { %2578 = vrcp.f32 %v275_v5  ;;  %v3692_v5 = vld [vmem:[#allocation8_spill] sm:$0xff] }
 0x135   :  { %v2577_v0 = vpop.eup %2576 }
 0x136   :  { %v278_v11 = vmul.f32 %v2577_v0, %v261_v54  ;;  %v2579_v23 = vpop.eup %2578  ;;  %v3693_v54 = vld [vmem:[#allocation2_spill] sm:$0xff]  ;;  %v1482_v0 = vld [vmem:[%s3663_s0 + $0x18] sm:$0xff] }
 0x137   :  { %v281_v41 = vsub.f32 1.0, %v2579_v23  ;;  %v283_v38 = vmul.f32 0.0, %v2579_v23 }
 0x138   :  { %v279_v16 = vadd.f32 %v278_v11, %v120_v10 }
 0x13a   :  { %2580 = vtanh.f32 %v279_v16 }
 0x144   :  { %v2581_v29 = vpop.eup %2580 }
 0x145   :  { %v282_v37 = vmul.f32 %v2581_v29, %v281_v41  ;;  %v3694_v29 = vld [vmem:[#allocation10_spill] sm:$0xff] }
 0x147   :  { %v3203_v52 = vadd.f32 %v283_v38, %v282_v37 }
 0x149   :  { %285 = vst [vmem:[%s3664_s4] sm:$0xff] %v3203_v52  ;;  %v291_v36 = vmul.f32 %v3203_v52, %v2858_v59  ;;  %v290_v40 = vmul.f32 %v3203_v52, %v3087_v57 }
 0x14b   :  { %356 = vmatprep.mubr.f32.mxu1 %v291_v36  ;;  %427 = vmatprep.mubr.f32.mxu0 %v291_v36 }
 0x14c   :  { %357 = vmatmul.mubr.f32.vlgmr.msra.gmra.mrb[2].mxu1 %v290_v40  ;;  %428 = vmatmul.mubr.f32.vlgmr.msra.gmra.mrb[2].mxu0 %v290_v40  ;;  %v1483_v40 = vld [vmem:[%s3663_s0 + $0x20] sm:$0xff] }
 0x14d   :  { %1999 = vmatpush1.bf16.msra.mxu0 %v2702_v7  ;;  %2063 = vmatpush3.bf16.msra.mxu1 %v2824_v48 }
 0x14e   :  { %2001 = vmatprep.subr.bf16.mxu0 %v2704_v8  ;;  %2065 = vmatprep.subr.bf16.mxu1 %v2838_v53 }
 0x151   :  { %2003 = vmatpush1.bf16.msra.mxu0 %v2720_v13  ;;  %2067 = vmatpush3.bf16.msra.mxu1 %v2853_v58 }
 0x152   :  { %2005 = vmatprep.subr.bf16.mxu0 %v2723_v14  ;;  %2069 = vmatprep.subr.bf16.mxu1 %v2880_v4 }
 0x155   :  { %2007 = vmatpush1.bf16.msra.mxu0 %v2738_v19  ;;  %2071 = vmatpush3.bf16.msra.mxu1 %v2898_v12 }
 0x156   :  { %2009 = vmatprep.subr.bf16.mxu0 %v2741_v20  ;;  %2073 = vmatprep.subr.bf16.mxu1 %v2907_v17 }
 0x159   :  { %2011 = vmatpush1.bf16.msra.mxu0 %v2756_v25  ;;  %2075 = vmatpush3.bf16.msra.mxu1 %v2934_v30 }
 0x15a   :  { %2013 = vmatprep.subr.bf16.mxu0 %v2759_v26  ;;  %2077 = vmatprep.subr.bf16.mxu1 %v2943_v35 }
 0x15d   :  { %2015 = vmatpush1.bf16.msra.mxu0 %v2774_v31  ;;  %2079 = vmatpush3.bf16.msra.mxu1 %v2970_v47 }
 0x15e   :  { %2017 = vmatprep.subr.bf16.mxu0 %v2777_v32  ;;  %2081 = vmatprep.subr.bf16.mxu1 %v2979_v51 }
 0x161   :  { %2019 = vmatpush1.bf16.msra.mxu0 %v2798_v39  ;;  %2083 = vmatpush3.bf16.msra.mxu1 %v3006_v1 }
 0x162   :  { %2021 = vmatprep.subr.bf16.mxu0 %v2809_v43  ;;  %2085 = vmatprep.subr.bf16.mxu1 %v3015_v6 }
 0x165   :  { %2023 = vmatpush1.bf16.msra.mxu0 %v2847_v56  ;;  %2087 = vmatpush3.bf16.msra.mxu1 %v3039_v24 }
 0x166   :  { %2025 = vmatprep.subr.bf16.mxu0 %v2864_v61  ;;  %2089 = vmatprep.subr.bf16.mxu1 %v3048_v34 }
 0x169   :  { %2027 = vmatpush1.bf16.msra.mxu0 %v2889_v9  ;;  %2091 = vmatpush3.bf16.msra.mxu1 %v3066_v45 }
 0x16a   :  { %2029 = vmatprep.subr.bf16.mxu0 %v2901_v15  ;;  %2093 = vmatprep.subr.bf16.mxu1 %v2691_v3 }
 0x16d   :  { %2031 = vmatpush1.bf16.msra.mxu0 %v2925_v27 }
 0x16e   :  { %2033 = vmatprep.subr.bf16.mxu0 %v2937_v33 }
 0x171   :  { %2035 = vmatpush1.bf16.msra.mxu0 %v2961_v44 }
 0x172   :  { %2037 = vmatprep.subr.bf16.mxu0 %v2973_v49 }
 0x175   :  { %2039 = vmatpush1.bf16.msra.mxu0 %v2997_v62 }
 0x176   :  { %2041 = vmatprep.subr.bf16.mxu0 %v3009_v2 }
 0x179   :  { %2043 = vmatpush1.bf16.msra.mxu0 %v3033_v22 }
 0x17a   :  { %2045 = vmatprep.subr.bf16.mxu0 %v3042_v28 }
 0x17d   :  { %2047 = vmatpush1.bf16.msra.mxu0 %v3063_v42 }
 0x17e   :  { %2049 = vmatprep.subr.bf16.mxu0 %v3069_v46 }
 0x181   :  { %2051 = vmatpush1.bf16.msra.mxu0 %v3090_v60 }
 0x182   :  { %2053 = vmatprep.subr.bf16.mxu0 %v3094_v63 }
 0x185   :  { %2055 = vmatpush1.bf16.msra.mxu0 %v3111_v18 }
 0x186   :  { %2057 = vmatprep.subr.bf16.mxu0 %v3115_v21 }
 0x189   :  { %2059 = vmatpush1.bf16.msra.mxu0 %v3692_v5 }
 0x18a   :  { %2157 = vmatprep.subr.bf16.mxu0 %v3693_v54 }
 0x21f   :  { %v358_v10 = vpop.f32.mrb[2].mxu1  ;;  %v1591_v11 = vpop.f32.mrb[2].mxu0 }
 0x220   :  { %v359_v16 = vadd.f32 %v358_v10, %v3179_v50  ;;  %v360_v23 = vpop.f32.mrb[3].mxu1  ;;  %v1592_v41 = vpop.f32.mrb[3].mxu0 }
 0x221   :  { %v361_v37 = vadd.f32 %v360_v23, %v3694_v29  ;;  %v1593_v38 = vadd.f32 %v1592_v41, %v1591_v11  ;;  %v3697_v41 = vld [vmem:[#allocation5_spill] sm:$0xff] }
 0x222   :  { %v433_v36 = vadd.f32 %v1482_v0, %v359_v16  ;;  %v1484_v0 = vld [vmem:[%s3663_s0 + $0x28] sm:$0xff] }
 0x223   :  { %v440_v54 = vadd.f32 %v1483_v40, %v361_v37  ;;  %v430_v50 = vadd.f32 %v1593_v38, %v3197_v55  ;;  %v3698_v37 = vld [vmem:[#allocation6_spill] sm:$0xff]  ;;  %v3699_v38 = vld [vmem:[#allocation7_spill] sm:$0xff] }
 0x224   :  { %v1485_v5 = vmul.f32 -1.442695, %v433_v36  ;;  %v3700_v36 = vld [vmem:[#allocation8_spill] sm:$0xff]  ;;  %v3701_v40 = vld [vmem:[#allocation2_spill] sm:$0xff] }
 0x225   :  { %v1486_v21 = vmul.f32 -1.442695, %v440_v54 }
 0x226   :  { %2582 = vpow2.f32 %v1485_v5 }
 0x227   :  { %2584 = vpow2.f32 %v1486_v21 }
 0x230   :  { %v2583_v18 = vpop.eup %2582 }
 0x231   :  { %v437_v63 = vadd.f32 1.0, %v2583_v18  ;;  %v2585_v60 = vpop.eup %2584 }
 0x232   :  { %v444_v10 = vadd.f32 1.0, %v2585_v60 }
 0x233   :  { %2586 = vrcp.f32 %v437_v63 }
 0x234   :  { %2588 = vrcp.f32 %v444_v10  ;;  %v1488_v10 = vld [vmem:[%s3663_s0 + $0x30] sm:$0xff] }
 0x23d   :  { %v2587_v46 = vpop.eup %2586 }
 0x23e   :  { %v447_v11 = vmul.f32 %v2587_v46, %v430_v50  ;;  %v2589_v23 = vpop.eup %2588  ;;  %v3695_v50 = vld [vmem:[#allocation3_spill] sm:$0xff] }
 0x23f   :  { %v450_v5 = vsub.f32 1.0, %v2589_v23  ;;  %v452_v18 = vmul.f32 %v2589_v23, %v3203_v52  ;;  %v3696_v52 = vld [vmem:[#allocation4_spill] sm:$0xff] }
 0x240   :  { %v448_v16 = vadd.f32 %v1484_v0, %v447_v11 }
 0x242   :  { %2590 = vtanh.f32 %v448_v16  ;;  %v3702_v16 = vld [vmem:[#allocation9_spill] sm:$0xff] }
 0x24c   :  { %v2591_v54 = vpop.eup %2590 }
 0x24d   :  { %v451_v21 = vmul.f32 %v2591_v54, %v450_v5 }
 0x24f   :  { %v3274_v63 = vadd.f32 %v452_v18, %v451_v21 }
 0x251   :  { %1487 = vst [vmem:[%s3664_s4 + $0x8] sm:$0xff] %v3274_v63  ;;  %v461_v60 = vmul.f32 %v3274_v63, %v2858_v59  ;;  %v460_v46 = vmul.f32 %v3274_v63, %v3087_v57 }
 0x253   :  { %526 = vmatprep.mubr.f32.mxu0 %v461_v60  ;;  %597 = vmatprep.mubr.f32.mxu1 %v461_v60 }
 0x254   :  { %527 = vmatmul.mubr.f32.vlgmr.msra.gmra.mrb[4].mxu0 %v460_v46  ;;  %598 = vmatmul.mubr.f32.vlgmr.msra.gmra.mrb[4].mxu1 %v460_v46  ;;  %v1489_v46 = vld [vmem:[%s3663_s0 + $0x38] sm:$0xff] }
 0x255   :  { %2095 = vmatpush1.bf16.msra.mxu1 %v2702_v7  ;;  %2159 = vmatpush3.bf16.msra.mxu0 %v2824_v48 }
 0x256   :  { %2097 = vmatprep.subr.bf16.mxu1 %v2704_v8  ;;  %2161 = vmatprep.subr.bf16.mxu0 %v2838_v53 }
 0x259   :  { %2099 = vmatpush1.bf16.msra.mxu1 %v2720_v13  ;;  %2163 = vmatpush3.bf16.msra.mxu0 %v2853_v58 }
 0x25a   :  { %2101 = vmatprep.subr.bf16.mxu1 %v2723_v14  ;;  %2165 = vmatprep.subr.bf16.mxu0 %v2880_v4 }
 0x25d   :  { %2103 = vmatpush1.bf16.msra.mxu1 %v2738_v19  ;;  %2167 = vmatpush3.bf16.msra.mxu0 %v2898_v12 }
 0x25e   :  { %2105 = vmatprep.subr.bf16.mxu1 %v2741_v20  ;;  %2169 = vmatprep.subr.bf16.mxu0 %v2907_v17 }
 0x261   :  { %2107 = vmatpush1.bf16.msra.mxu1 %v2756_v25  ;;  %2171 = vmatpush3.bf16.msra.mxu0 %v2934_v30 }
 0x262   :  { %2109 = vmatprep.subr.bf16.mxu1 %v2759_v26  ;;  %2173 = vmatprep.subr.bf16.mxu0 %v2943_v35 }
 0x265   :  { %2111 = vmatpush1.bf16.msra.mxu1 %v2774_v31  ;;  %2175 = vmatpush3.bf16.msra.mxu0 %v2970_v47 }
 0x266   :  { %2113 = vmatprep.subr.bf16.mxu1 %v2777_v32  ;;  %2177 = vmatprep.subr.bf16.mxu0 %v2979_v51 }
 0x269   :  { %2115 = vmatpush1.bf16.msra.mxu1 %v2798_v39  ;;  %2179 = vmatpush3.bf16.msra.mxu0 %v3006_v1 }
 0x26a   :  { %2117 = vmatprep.subr.bf16.mxu1 %v2809_v43  ;;  %2181 = vmatprep.subr.bf16.mxu0 %v3015_v6 }
 0x26d   :  { %2119 = vmatpush1.bf16.msra.mxu1 %v2847_v56  ;;  %2183 = vmatpush3.bf16.msra.mxu0 %v3039_v24 }
 0x26e   :  { %2121 = vmatprep.subr.bf16.mxu1 %v2864_v61  ;;  %2185 = vmatprep.subr.bf16.mxu0 %v3048_v34 }
 0x271   :  { %2123 = vmatpush1.bf16.msra.mxu1 %v2889_v9  ;;  %2187 = vmatpush3.bf16.msra.mxu0 %v3066_v45 }
 0x272   :  { %2125 = vmatprep.subr.bf16.mxu1 %v2901_v15  ;;  %2189 = vmatprep.subr.bf16.mxu0 %v2691_v3 }
 0x275   :  { %2127 = vmatpush1.bf16.msra.mxu1 %v2925_v27 }
 0x276   :  { %2129 = vmatprep.subr.bf16.mxu1 %v2937_v33 }
 0x279   :  { %2131 = vmatpush1.bf16.msra.mxu1 %v2961_v44 }
 0x27a   :  { %2133 = vmatprep.subr.bf16.mxu1 %v2973_v49 }
 0x27d   :  { %2135 = vmatpush1.bf16.msra.mxu1 %v2997_v62 }
 0x27e   :  { %2137 = vmatprep.subr.bf16.mxu1 %v3009_v2 }
 0x281   :  { %2139 = vmatpush1.bf16.msra.mxu1 %v3033_v22 }
 0x282   :  { %2141 = vmatprep.subr.bf16.mxu1 %v3042_v28 }
 0x285   :  { %2143 = vmatpush1.bf16.msra.mxu1 %v3063_v42 }
 0x286   :  { %2145 = vmatprep.subr.bf16.mxu1 %v3695_v50 }
 0x289   :  { %2147 = vmatpush1.bf16.msra.mxu1 %v3696_v52 }
 0x28a   :  { %2149 = vmatprep.subr.bf16.mxu1 %v3697_v41 }
 0x28d   :  { %2151 = vmatpush1.bf16.msra.mxu1 %v3698_v37 }
 0x28e   :  { %2153 = vmatprep.subr.bf16.mxu1 %v3699_v38 }
 0x291   :  { %2155 = vmatpush1.bf16.msra.mxu1 %v3700_v36 }
 0x292   :  { %2253 = vmatprep.subr.bf16.mxu1 %v3701_v40 }
 0x327   :  { %v528_v0 = vpop.f32.mrb[4].mxu0  ;;  %v1626_v11 = vpop.f32.mrb[4].mxu1 }
 0x328   :  { %v529_v23 = vadd.f32 %v528_v0, %v3702_v16  ;;  %v530_v5 = vpop.f32.mrb[5].mxu0  ;;  %v1627_v54 = vpop.f32.mrb[5].mxu1 }
 0x329   :  { %v531_v21 = vadd.f32 %v530_v5, %v3694_v29  ;;  %v1628_v18 = vadd.f32 %v1627_v54, %v1626_v11  ;;  %v3705_v54 = vld [vmem:[#allocation5_spill] sm:$0xff] }
 0x32a   :  { %v603_v60 = vadd.f32 %v1488_v10, %v529_v23  ;;  %v1490_v10 = vld [vmem:[%s3663_s0 + $0x40] sm:$0xff] }
 0x32b   :  { %v610_v40 = vadd.f32 %v1489_v46, %v531_v21  ;;  %v600_v16 = vadd.f32 %v1628_v18, %v3197_v55  ;;  %v3706_v21 = vld [vmem:[#allocation6_spill] sm:$0xff]  ;;  %v3707_v18 = vld [vmem:[#allocation7_spill] sm:$0xff] }
 0x32c   :  { %v1491_v36 = vmul.f32 -1.442695, %v603_v60  ;;  %v3708_v60 = vld [vmem:[#allocation8_spill] sm:$0xff]  ;;  %v3709_v46 = vld [vmem:[#allocation2_spill] sm:$0xff] }
 0x32d   :  { %v1492_v38 = vmul.f32 -1.442695, %v610_v40 }
 0x32e   :  { %2592 = vpow2.f32 %v1491_v36 }
 0x32f   :  { %2594 = vpow2.f32 %v1492_v38 }
 0x338   :  { %v2593_v37 = vpop.eup %2592 }
 0x339   :  { %v607_v41 = vadd.f32 1.0, %v2593_v37  ;;  %v2595_v52 = vpop.eup %2594 }
 0x33a   :  { %v614_v0 = vadd.f32 1.0, %v2595_v52 }
 0x33b   :  { %2596 = vrcp.f32 %v607_v41 }
 0x33c   :  { %2598 = vrcp.f32 %v614_v0  ;;  %v1494_v0 = vld [vmem:[%s3663_s0 + $0x48] sm:$0xff] }
 0x345   :  { %v2597_v50 = vpop.eup %2596 }
 0x346   :  { %v617_v11 = vmul.f32 %v2597_v50, %v600_v16  ;;  %v2599_v5 = vpop.eup %2598  ;;  %v3704_v16 = vld [vmem:[#allocation4_spill] sm:$0xff] }
 0x347   :  { %v620_v36 = vsub.f32 1.0, %v2599_v5  ;;  %v622_v37 = vmul.f32 %v2599_v5, %v3274_v63  ;;  %v3703_v63 = vld [vmem:[#allocation3_spill] sm:$0xff] }
 0x348   :  { %v618_v23 = vadd.f32 %v1490_v10, %v617_v11 }
 0x34a   :  { %2600 = vtanh.f32 %v618_v23  ;;  %v3710_v23 = vld [vmem:[#allocation9_spill] sm:$0xff] }
 0x354   :  { %v2601_v40 = vpop.eup %2600 }
 0x355   :  { %v621_v38 = vmul.f32 %v2601_v40, %v620_v36 }
 0x357   :  { %v3345_v41 = vadd.f32 %v622_v37, %v621_v38 }
 0x359   :  { %1493 = vst [vmem:[%s3664_s4 + $0x10] sm:$0xff] %v3345_v41  ;;  %v631_v52 = vmul.f32 %v3345_v41, %v2858_v59  ;;  %v630_v50 = vmul.f32 %v3345_v41, %v3087_v57 }
 0x35b   :  { %696 = vmatprep.mubr.f32.mxu1 %v631_v52  ;;  %767 = vmatprep.mubr.f32.mxu0 %v631_v52 }
 0x35c   :  { %697 = vmatmul.mubr.f32.vlgmr.msra.gmra.mrb[6].mxu1 %v630_v50  ;;  %768 = vmatmul.mubr.f32.vlgmr.msra.gmra.mrb[6].mxu0 %v630_v50  ;;  %v1495_v50 = vld [vmem:[%s3663_s0 + $0x50] sm:$0xff] }
 0x35d   :  { %2191 = vmatpush1.bf16.msra.mxu0 %v2702_v7  ;;  %2255 = vmatpush3.bf16.msra.mxu1 %v2824_v48 }
 0x35e   :  { %2193 = vmatprep.subr.bf16.mxu0 %v2704_v8  ;;  %2257 = vmatprep.subr.bf16.mxu1 %v2838_v53 }
 0x361   :  { %2195 = vmatpush1.bf16.msra.mxu0 %v2720_v13  ;;  %2259 = vmatpush3.bf16.msra.mxu1 %v2853_v58 }
 0x362   :  { %2197 = vmatprep.subr.bf16.mxu0 %v2723_v14  ;;  %2261 = vmatprep.subr.bf16.mxu1 %v2880_v4 }
 0x365   :  { %2199 = vmatpush1.bf16.msra.mxu0 %v2738_v19  ;;  %2263 = vmatpush3.bf16.msra.mxu1 %v2898_v12 }
 0x366   :  { %2201 = vmatprep.subr.bf16.mxu0 %v2741_v20  ;;  %2265 = vmatprep.subr.bf16.mxu1 %v2907_v17 }
 0x369   :  { %2203 = vmatpush1.bf16.msra.mxu0 %v2756_v25  ;;  %2267 = vmatpush3.bf16.msra.mxu1 %v2934_v30 }
 0x36a   :  { %2205 = vmatprep.subr.bf16.mxu0 %v2759_v26  ;;  %2269 = vmatprep.subr.bf16.mxu1 %v2943_v35 }
 0x36d   :  { %2207 = vmatpush1.bf16.msra.mxu0 %v2774_v31  ;;  %2271 = vmatpush3.bf16.msra.mxu1 %v2970_v47 }
 0x36e   :  { %2209 = vmatprep.subr.bf16.mxu0 %v2777_v32  ;;  %2273 = vmatprep.subr.bf16.mxu1 %v2979_v51 }
 0x371   :  { %2211 = vmatpush1.bf16.msra.mxu0 %v2798_v39  ;;  %2275 = vmatpush3.bf16.msra.mxu1 %v3006_v1 }
 0x372   :  { %2213 = vmatprep.subr.bf16.mxu0 %v2809_v43  ;;  %2277 = vmatprep.subr.bf16.mxu1 %v3015_v6 }
 0x375   :  { %2215 = vmatpush1.bf16.msra.mxu0 %v2847_v56  ;;  %2279 = vmatpush3.bf16.msra.mxu1 %v3039_v24 }
 0x376   :  { %2217 = vmatprep.subr.bf16.mxu0 %v2864_v61  ;;  %2281 = vmatprep.subr.bf16.mxu1 %v3048_v34 }
 0x379   :  { %2219 = vmatpush1.bf16.msra.mxu0 %v2889_v9  ;;  %2283 = vmatpush3.bf16.msra.mxu1 %v3066_v45 }
 0x37a   :  { %2221 = vmatprep.subr.bf16.mxu0 %v2901_v15  ;;  %2285 = vmatprep.subr.bf16.mxu1 %v2691_v3 }
 0x37d   :  { %2223 = vmatpush1.bf16.msra.mxu0 %v2925_v27 }
 0x37e   :  { %2225 = vmatprep.subr.bf16.mxu0 %v2937_v33 }
 0x381   :  { %2227 = vmatpush1.bf16.msra.mxu0 %v2961_v44 }
 0x382   :  { %2229 = vmatprep.subr.bf16.mxu0 %v2973_v49 }
 0x385   :  { %2231 = vmatpush1.bf16.msra.mxu0 %v2997_v62 }
 0x386   :  { %2233 = vmatprep.subr.bf16.mxu0 %v3009_v2 }
 0x389   :  { %2235 = vmatpush1.bf16.msra.mxu0 %v3033_v22 }
 0x38a   :  { %2237 = vmatprep.subr.bf16.mxu0 %v3042_v28 }
 0x38d   :  { %2239 = vmatpush1.bf16.msra.mxu0 %v3063_v42 }
 0x38e   :  { %2241 = vmatprep.subr.bf16.mxu0 %v3703_v63 }
 0x391   :  { %2243 = vmatpush1.bf16.msra.mxu0 %v3704_v16 }
 0x392   :  { %2245 = vmatprep.subr.bf16.mxu0 %v3705_v54 }
 0x395   :  { %2247 = vmatpush1.bf16.msra.mxu0 %v3706_v21 }
 0x396   :  { %2249 = vmatprep.subr.bf16.mxu0 %v3707_v18 }
 0x399   :  { %2251 = vmatpush1.bf16.msra.mxu0 %v3708_v60 }
 0x39a   :  { %2349 = vmatprep.subr.bf16.mxu0 %v3709_v46 }
 0x42f   :  { %v698_v10 = vpop.f32.mrb[6].mxu1  ;;  %v1661_v11 = vpop.f32.mrb[6].mxu0 }
 0x430   :  { %v699_v5 = vadd.f32 %v698_v10, %v3710_v23  ;;  %v700_v36 = vpop.f32.mrb[7].mxu1  ;;  %v1662_v40 = vpop.f32.mrb[7].mxu0 }
 0x431   :  { %v701_v38 = vadd.f32 %v700_v36, %v3694_v29  ;;  %v1663_v37 = vadd.f32 %v1662_v40, %v1661_v11  ;;  %v3714_v40 = vld [vmem:[#allocation6_spill] sm:$0xff] }
 0x432   :  { %v773_v52 = vadd.f32 %v1494_v0, %v699_v5  ;;  %v1496_v0 = vld [vmem:[%s3663_s0 + $0x58] sm:$0xff] }
 0x433   :  { %v780_v46 = vadd.f32 %v1495_v50, %v701_v38  ;;  %v770_v23 = vadd.f32 %v1663_v37, %v3197_v55  ;;  %v3715_v38 = vld [vmem:[#allocation7_spill] sm:$0xff]  ;;  %v3716_v37 = vld [vmem:[#allocation8_spill] sm:$0xff]  ;;  %v1500_v50 = vld [vmem:[%s3663_s0 + $0x60] sm:$0xff] }
 0x434   :  { %v1497_v60 = vmul.f32 -1.442695, %v773_v52  ;;  %v3717_v52 = vld [vmem:[#allocation2_spill] sm:$0xff] }
 0x435   :  { %v1498_v18 = vmul.f32 -1.442695, %v780_v46 }
 0x436   :  { %2602 = vpow2.f32 %v1497_v60 }
 0x437   :  { %2604 = vpow2.f32 %v1498_v18 }
 0x440   :  { %v2603_v21 = vpop.eup %2602 }
 0x441   :  { %v777_v54 = vadd.f32 1.0, %v2603_v21  ;;  %v2605_v16 = vpop.eup %2604 }
 0x442   :  { %v784_v10 = vadd.f32 1.0, %v2605_v16 }
 0x443   :  { %2606 = vrcp.f32 %v777_v54 }
 0x444   :  { %2608 = vrcp.f32 %v784_v10 }
 0x44d   :  { %v2607_v63 = vpop.eup %2606 }
 0x44e   :  { %v787_v11 = vmul.f32 %v2607_v63, %v770_v23  ;;  %v2609_v36 = vpop.eup %2608  ;;  %v3713_v23 = vld [vmem:[#allocation5_spill] sm:$0xff] }
 0x44f   :  { %v790_v60 = vsub.f32 1.0, %v2609_v36  ;;  %v792_v21 = vmul.f32 %v2609_v36, %v3345_v41  ;;  %v3712_v41 = vld [vmem:[#allocation4_spill] sm:$0xff] }
 0x450   :  { %v788_v5 = vadd.f32 %v1496_v0, %v787_v11  ;;  %v3718_v11 = vld [vmem:[#allocation9_spill] sm:$0xff] }
 0x452   :  { %2610 = vtanh.f32 %v788_v5 }
 0x45c   :  { %v2611_v46 = vpop.eup %2610 }
 0x45d   :  { %v791_v18 = vmul.f32 %v2611_v46, %v790_v60 }
 0x45f   :  { %v3416_v54 = vadd.f32 %v792_v21, %v791_v18 }
 0x461   :  { %1499 = vst [vmem:[%s3664_s4 + $0x18] sm:$0xff] %v3416_v54  ;;  %v801_v16 = vmul.f32 %v3416_v54, %v2858_v59  ;;  %v800_v63 = vmul.f32 %v3416_v54, %v3087_v57  ;;  %v3711_v59 = vld [vmem:[#allocation3_spill] sm:$0xff] }
 0x463   :  { %866 = vmatprep.mubr.f32.mxu0 %v801_v16  ;;  %937 = vmatprep.mubr.f32.mxu1 %v801_v16  ;;  %v1501_v16 = vld [vmem:[%s3663_s0 + $0x68] sm:$0xff] }
 0x464   :  { %867 = vmatmul.mubr.f32.vlgmr.msra.gmra.mrb[8].mxu0 %v800_v63  ;;  %938 = vmatmul.mubr.f32.vlgmr.msra.gmra.mrb[8].mxu1 %v800_v63 }
 0x465   :  { %2287 = vmatpush1.bf16.msra.mxu1 %v2702_v7  ;;  %2351 = vmatpush3.bf16.msra.mxu0 %v2824_v48 }
 0x466   :  { %2289 = vmatprep.subr.bf16.mxu1 %v2704_v8  ;;  %2353 = vmatprep.subr.bf16.mxu0 %v2838_v53 }
 0x469   :  { %2291 = vmatpush1.bf16.msra.mxu1 %v2720_v13  ;;  %2355 = vmatpush3.bf16.msra.mxu0 %v2853_v58 }
 0x46a   :  { %2293 = vmatprep.subr.bf16.mxu1 %v2723_v14  ;;  %2357 = vmatprep.subr.bf16.mxu0 %v2880_v4 }
 0x46d   :  { %2295 = vmatpush1.bf16.msra.mxu1 %v2738_v19  ;;  %2359 = vmatpush3.bf16.msra.mxu0 %v2898_v12 }
 0x46e   :  { %2297 = vmatprep.subr.bf16.mxu1 %v2741_v20  ;;  %2361 = vmatprep.subr.bf16.mxu0 %v2907_v17 }
 0x471   :  { %2299 = vmatpush1.bf16.msra.mxu1 %v2756_v25  ;;  %2363 = vmatpush3.bf16.msra.mxu0 %v2934_v30 }
 0x472   :  { %2301 = vmatprep.subr.bf16.mxu1 %v2759_v26  ;;  %2365 = vmatprep.subr.bf16.mxu0 %v2943_v35 }
 0x475   :  { %2303 = vmatpush1.bf16.msra.mxu1 %v2774_v31  ;;  %2367 = vmatpush3.bf16.msra.mxu0 %v2970_v47 }
 0x476   :  { %2305 = vmatprep.subr.bf16.mxu1 %v2777_v32  ;;  %2369 = vmatprep.subr.bf16.mxu0 %v2979_v51 }
 0x479   :  { %2307 = vmatpush1.bf16.msra.mxu1 %v2798_v39  ;;  %2371 = vmatpush3.bf16.msra.mxu0 %v3006_v1 }
 0x47a   :  { %2309 = vmatprep.subr.bf16.mxu1 %v2809_v43  ;;  %2373 = vmatprep.subr.bf16.mxu0 %v3015_v6 }
 0x47d   :  { %2311 = vmatpush1.bf16.msra.mxu1 %v2847_v56  ;;  %2375 = vmatpush3.bf16.msra.mxu0 %v3039_v24 }
 0x47e   :  { %2313 = vmatprep.subr.bf16.mxu1 %v2864_v61  ;;  %2377 = vmatprep.subr.bf16.mxu0 %v3048_v34 }
 0x481   :  { %2315 = vmatpush1.bf16.msra.mxu1 %v2889_v9  ;;  %2379 = vmatpush3.bf16.msra.mxu0 %v3066_v45 }
 0x482   :  { %2317 = vmatprep.subr.bf16.mxu1 %v2901_v15  ;;  %2381 = vmatprep.subr.bf16.mxu0 %v2691_v3 }
 0x485   :  { %2319 = vmatpush1.bf16.msra.mxu1 %v2925_v27 }
 0x486   :  { %2321 = vmatprep.subr.bf16.mxu1 %v2937_v33 }
 0x489   :  { %2323 = vmatpush1.bf16.msra.mxu1 %v2961_v44 }
 0x48a   :  { %2325 = vmatprep.subr.bf16.mxu1 %v2973_v49 }
 0x48d   :  { %2327 = vmatpush1.bf16.msra.mxu1 %v2997_v62 }
 0x48e   :  { %2329 = vmatprep.subr.bf16.mxu1 %v3009_v2 }
 0x491   :  { %2331 = vmatpush1.bf16.msra.mxu1 %v3033_v22 }
 0x492   :  { %2333 = vmatprep.subr.bf16.mxu1 %v3042_v28 }
 0x495   :  { %2335 = vmatpush1.bf16.msra.mxu1 %v3063_v42 }
 0x496   :  { %2337 = vmatprep.subr.bf16.mxu1 %v3711_v59 }
 0x499   :  { %2339 = vmatpush1.bf16.msra.mxu1 %v3712_v41 }
 0x49a   :  { %2341 = vmatprep.subr.bf16.mxu1 %v3713_v23 }
 0x49d   :  { %2343 = vmatpush1.bf16.msra.mxu1 %v3714_v40 }
 0x49e   :  { %2345 = vmatprep.subr.bf16.mxu1 %v3715_v38 }
 0x4a1   :  { %2347 = vmatpush1.bf16.msra.mxu1 %v3716_v37 }
 0x4a2   :  { %2445 = vmatprep.subr.bf16.mxu1 %v3717_v52 }
 0x537   :  { %v868_v10 = vpop.f32.mrb[8].mxu0  ;;  %v1696_v0 = vpop.f32.mrb[8].mxu1 }
 0x538   :  { %v869_v5 = vadd.f32 %v868_v10, %v3718_v11  ;;  %v870_v36 = vpop.f32.mrb[9].mxu0  ;;  %v1697_v60 = vpop.f32.mrb[9].mxu1 }
 0x539   :  { %v871_v46 = vadd.f32 %v870_v36, %v3694_v29  ;;  %v1698_v18 = vadd.f32 %v1697_v60, %v1696_v0 }
 0x53a   :  { %v943_v21 = vadd.f32 %v1500_v50, %v869_v5  ;;  %v1502_v50 = vld [vmem:[%s3663_s0 + $0x70] sm:$0xff] }
 0x53b   :  { %v950_v52 = vadd.f32 %v1501_v16, %v871_v46  ;;  %v940_v11 = vadd.f32 %v1698_v18, %v3197_v55  ;;  %v3722_v46 = vld [vmem:[#allocation7_spill] sm:$0xff]  ;;  %v3723_v18 = vld [vmem:[#allocation8_spill] sm:$0xff]  ;;  %v1506_v16 = vld [vmem:[%s3663_s0 + $0x78] sm:$0xff] }
 0x53c   :  { %v1503_v63 = vmul.f32 -1.442695, %v943_v21  ;;  %v3724_v21 = vld [vmem:[#allocation2_spill] sm:$0xff] }
 0x53d   :  { %v1504_v37 = vmul.f32 -1.442695, %v950_v52 }
 0x53e   :  { %2612 = vpow2.f32 %v1503_v63 }
 0x53f   :  { %2614 = vpow2.f32 %v1504_v37 }
 0x548   :  { %v2613_v38 = vpop.eup %2612 }
 0x549   :  { %v947_v40 = vadd.f32 1.0, %v2613_v38  ;;  %v2615_v23 = vpop.eup %2614 }
 0x54a   :  { %v954_v10 = vadd.f32 1.0, %v2615_v23  ;;  %v3496_v23 = vld [vmem:[%s3661_s3 + $0x8] sm:$0xff] }
 0x54b   :  { %2616 = vrcp.f32 %v947_v40 }
 0x54c   :  { %2618 = vrcp.f32 %v954_v10 }
 0x555   :  { %v2617_v41 = vpop.eup %2616 }
 0x556   :  { %v957_v0 = vmul.f32 %v2617_v41, %v940_v11  ;;  %v2619_v36 = vpop.eup %2618 }
 0x557   :  { %v960_v60 = vsub.f32 1.0, %v2619_v36  ;;  %v962_v38 = vmul.f32 %v2619_v36, %v3416_v54  ;;  %v3721_v54 = vld [vmem:[#allocation6_spill] sm:$0xff] }
 0x558   :  { %v958_v5 = vadd.f32 %v1502_v50, %v957_v0  ;;  %v3725_v50 = vld [vmem:[#allocation9_spill] sm:$0xff] }
 0x55a   :  { %2620 = vtanh.f32 %v958_v5 }
 0x564   :  { %v2621_v52 = vpop.eup %2620 }
 0x565   :  { %v961_v37 = vmul.f32 %v2621_v52, %v960_v60 }
 0x567   :  { %v3487_v40 = vadd.f32 %v962_v38, %v961_v37  ;;  %v1507_v38 = vld [vmem:[%s3663_s0 + $0x80] sm:$0xff] }
 0x569   :  { %1505 = vst [vmem:[%s3664_s4 + $0x20] sm:$0xff] %v3487_v40  ;;  %v971_v41 = vmul.f32 %v3496_v23, %v3487_v40  ;;  %v970_v11 = vmul.f32 %v3487_v40, %v3087_v57  ;;  %v3720_v57 = vld [vmem:[#allocation5_spill] sm:$0xff] }
 0x56b   :  { %1036 = vmatprep.mubr.f32.mxu1 %v971_v41  ;;  %1107 = vmatprep.mubr.f32.mxu0 %v971_v41 }
 0x56c   :  { %1037 = vmatmul.mubr.f32.vlgmr.msra.gmra.mrb[10].mxu1 %v970_v11  ;;  %1108 = vmatmul.mubr.f32.vlgmr.msra.gmra.mrb[10].mxu0 %v970_v11 }
 0x56d   :  { %2383 = vmatpush1.bf16.msra.mxu0 %v2702_v7  ;;  %2447 = vmatpush3.bf16.msra.mxu1 %v2824_v48 }
 0x56e   :  { %2385 = vmatprep.subr.bf16.mxu0 %v2704_v8  ;;  %2449 = vmatprep.subr.bf16.mxu1 %v2838_v53 }
 0x571   :  { %2387 = vmatpush1.bf16.msra.mxu0 %v2720_v13  ;;  %2451 = vmatpush3.bf16.msra.mxu1 %v2853_v58 }
 0x572   :  { %2389 = vmatprep.subr.bf16.mxu0 %v2723_v14  ;;  %2453 = vmatprep.subr.bf16.mxu1 %v2880_v4 }
 0x575   :  { %2391 = vmatpush1.bf16.msra.mxu0 %v2738_v19  ;;  %2455 = vmatpush3.bf16.msra.mxu1 %v2898_v12 }
 0x576   :  { %2393 = vmatprep.subr.bf16.mxu0 %v2741_v20  ;;  %2457 = vmatprep.subr.bf16.mxu1 %v2907_v17 }
 0x579   :  { %2395 = vmatpush1.bf16.msra.mxu0 %v2756_v25  ;;  %2459 = vmatpush3.bf16.msra.mxu1 %v2934_v30 }
 0x57a   :  { %2397 = vmatprep.subr.bf16.mxu0 %v2759_v26  ;;  %2461 = vmatprep.subr.bf16.mxu1 %v2943_v35 }
 0x57d   :  { %2399 = vmatpush1.bf16.msra.mxu0 %v2774_v31  ;;  %2463 = vmatpush3.bf16.msra.mxu1 %v2970_v47 }
 0x57e   :  { %2401 = vmatprep.subr.bf16.mxu0 %v2777_v32  ;;  %2465 = vmatprep.subr.bf16.mxu1 %v2979_v51 }
 0x581   :  { %2403 = vmatpush1.bf16.msra.mxu0 %v2798_v39  ;;  %2467 = vmatpush3.bf16.msra.mxu1 %v3006_v1 }
 0x582   :  { %2405 = vmatprep.subr.bf16.mxu0 %v2809_v43  ;;  %2469 = vmatprep.subr.bf16.mxu1 %v3015_v6 }
 0x585   :  { %2407 = vmatpush1.bf16.msra.mxu0 %v2847_v56  ;;  %2471 = vmatpush3.bf16.msra.mxu1 %v3039_v24 }
 0x586   :  { %2409 = vmatprep.subr.bf16.mxu0 %v2864_v61  ;;  %2473 = vmatprep.subr.bf16.mxu1 %v3048_v34 }
 0x589   :  { %2411 = vmatpush1.bf16.msra.mxu0 %v2889_v9  ;;  %2475 = vmatpush3.bf16.msra.mxu1 %v3066_v45 }
 0x58a   :  { %2413 = vmatprep.subr.bf16.mxu0 %v2901_v15  ;;  %2477 = vmatprep.subr.bf16.mxu1 %v2691_v3  ;;  %v3719_v3 = vld [vmem:[#allocation4_spill] sm:$0xff] }
 0x58d   :  { %2415 = vmatpush1.bf16.msra.mxu0 %v2925_v27 }
 0x58e   :  { %2417 = vmatprep.subr.bf16.mxu0 %v2937_v33 }
 0x591   :  { %2419 = vmatpush1.bf16.msra.mxu0 %v2961_v44 }
 0x592   :  { %2421 = vmatprep.subr.bf16.mxu0 %v2973_v49 }
 0x595   :  { %2423 = vmatpush1.bf16.msra.mxu0 %v2997_v62 }
 0x596   :  { %2425 = vmatprep.subr.bf16.mxu0 %v3009_v2 }
 0x599   :  { %2427 = vmatpush1.bf16.msra.mxu0 %v3033_v22 }
 0x59a   :  { %2429 = vmatprep.subr.bf16.mxu0 %v3042_v28 }
 0x59d   :  { %2431 = vmatpush1.bf16.msra.mxu0 %v3063_v42 }
 0x59e   :  { %2433 = vmatprep.subr.bf16.mxu0 %v3711_v59 }
 0x5a1   :  { %2435 = vmatpush1.bf16.msra.mxu0 %v3719_v3 }
 0x5a2   :  { %2437 = vmatprep.subr.bf16.mxu0 %v3720_v57 }
 0x5a5   :  { %2439 = vmatpush1.bf16.msra.mxu0 %v3721_v54 }
 0x5a6   :  { %2441 = vmatprep.subr.bf16.mxu0 %v3722_v46 }
 0x5a9   :  { %2443 = vmatpush1.bf16.msra.mxu0 %v3723_v18 }
 0x5aa   :  { %2541 = vmatprep.subr.bf16.mxu0 %v3724_v21 }
 0x63f   :  { %v1038_v63 = vpop.f32.mrb[10].mxu1  ;;  %v1731_v10 = vpop.f32.mrb[10].mxu0 }
 0x640   :  { %v1039_v0 = vadd.f32 %v1038_v63, %v3725_v50  ;;  %v1040_v5 = vpop.f32.mrb[11].mxu1  ;;  %v1732_v36 = vpop.f32.mrb[11].mxu0 }
 0x641   :  { %v1041_v60 = vadd.f32 %v1040_v5, %v3694_v29  ;;  %v1733_v52 = vadd.f32 %v1732_v36, %v1731_v10  ;;  %v1508_v29 = vld [vmem:[%s3663_s0 + $0x88] sm:$0xff] }
 0x642   :  { %v1113_v37 = vadd.f32 %v1506_v16, %v1039_v0 }
 0x643   :  { %v1120_v11 = vadd.f32 %v1507_v38, %v1041_v60  ;;  %v1110_v50 = vadd.f32 %v1733_v52, %v3197_v55 }
 0x644   :  { %v1509_v41 = vmul.f32 -1.442695, %v1113_v37 }
 0x645   :  { %v1510_v21 = vmul.f32 -1.442695, %v1120_v11 }
 0x646   :  { %2622 = vpow2.f32 %v1509_v41 }
 0x647   :  { %2624 = vpow2.f32 %v1510_v21 }
 0x650   :  { %v2623_v18 = vpop.eup %2622 }
 0x651   :  { %v1117_v46 = vadd.f32 1.0, %v2623_v18  ;;  %v2625_v54 = vpop.eup %2624 }
 0x652   :  { %v1124_v63 = vadd.f32 1.0, %v2625_v54 }
 0x653   :  { %2626 = vrcp.f32 %v1117_v46 }
 0x654   :  { %2628 = vrcp.f32 %v1124_v63 }
 0x65d   :  { %v2627_v57 = vpop.eup %2626 }
 0x65e   :  { %v1127_v16 = vmul.f32 %v2627_v57, %v1110_v50  ;;  %v2629_v0 = vpop.eup %2628  ;;  %v3574_v57 = vld [vmem:[%s3661_s3] sm:$0xff] }
 0x65f   :  { %v1130_v5 = vsub.f32 1.0, %v2629_v0  ;;  %v1132_v18 = vmul.f32 %v2629_v0, %v3487_v40 }
 0x660   :  { %v1128_v10 = vadd.f32 %v1508_v29, %v1127_v16 }
 0x662   :  { %2630 = vtanh.f32 %v1128_v10 }
 0x66c   :  { %v2631_v36 = vpop.eup %2630 }
 0x66d   :  { %v1131_v60 = vmul.f32 %v2631_v36, %v1130_v5  ;;  %v1520_v5 = vld [vmem:[%s3663_s0 + $0xb8] sm:$0xff] }
 0x66f   :  { %v3563_v46 = vadd.f32 %v1132_v18, %v1131_v60 }
 0x671   :  { %1511 = vst [vmem:[%s3664_s4 + $0x28] sm:$0xff] %v3563_v46  ;;  %v1141_v55 = vmul.f32 %v3496_v23, %v3563_v46  ;;  %v1140_v54 = vmul.f32 %v3574_v57, %v3563_v46 }
 0x673   :  { %1206 = vmatprep.mubr.f32.mxu0 %v1141_v55  ;;  %1277 = vmatprep.mubr.f32.mxu1 %v1141_v55 }
 0x674   :  { %1207 = vmatmul.mubr.f32.vlgmr.msra.gmra.mrb[12].mxu0 %v1140_v54  ;;  %1278 = vmatmul.mubr.f32.vlgmr.msra.gmra.mrb[12].mxu1 %v1140_v54 }
 0x675   :  { %2479 = vmatpush1.bf16.msra.mxu1 %v2702_v7  ;;  %2543 = vmatpush3.bf16.msra.mxu0 %v2824_v48  ;;  %v3726_v7 = vld [vmem:[#allocation5_spill] sm:$0xff] }
 0x676   :  { %2481 = vmatprep.subr.bf16.mxu1 %v2704_v8  ;;  %2545 = vmatprep.subr.bf16.mxu0 %v2838_v53  ;;  %v3727_v8 = vld [vmem:[#allocation6_spill] sm:$0xff] }
 0x679   :  { %2483 = vmatpush1.bf16.msra.mxu1 %v2720_v13  ;;  %2547 = vmatpush3.bf16.msra.mxu0 %v2853_v58  ;;  %v3728_v13 = vld [vmem:[#allocation7_spill] sm:$0xff]  ;;  %v1513_v58 = vld [vmem:[%s3663_s0 + $0x98] sm:$0xff] }
 0x67a   :  { %2485 = vmatprep.subr.bf16.mxu1 %v2723_v14  ;;  %2549 = vmatprep.subr.bf16.mxu0 %v2880_v4  ;;  %v3729_v14 = vld [vmem:[#allocation8_spill] sm:$0xff] }
 0x67d   :  { %2487 = vmatpush1.bf16.msra.mxu1 %v2738_v19  ;;  %2551 = vmatpush3.bf16.msra.mxu0 %v2898_v12  ;;  %v1512_v19 = vld [vmem:[%s3663_s0 + $0x90] sm:$0xff] }
 0x67e   :  { %2489 = vmatprep.subr.bf16.mxu1 %v2741_v20  ;;  %2553 = vmatprep.subr.bf16.mxu0 %v2907_v17 }
 0x681   :  { %2491 = vmatpush1.bf16.msra.mxu1 %v2756_v25  ;;  %2555 = vmatpush3.bf16.msra.mxu0 %v2934_v30  ;;  %v2656_v30 = vld [vmem:[%s3662_s2 + $0x10] sm:$0xff] }
 0x682   :  { %2493 = vmatprep.subr.bf16.mxu1 %v2759_v26  ;;  %2557 = vmatprep.subr.bf16.mxu0 %v2943_v35  ;;  %v2654_v26 = vld [vmem:[%s3662_s2] sm:$0xff] }
 0x685   :  { %2495 = vmatpush1.bf16.msra.mxu1 %v2774_v31  ;;  %2559 = vmatpush3.bf16.msra.mxu0 %v2970_v47 }
 0x686   :  { %2497 = vmatprep.subr.bf16.mxu1 %v2777_v32  ;;  %2561 = vmatprep.subr.bf16.mxu0 %v2979_v51 }
 0x689   :  { %2499 = vmatpush1.bf16.msra.mxu1 %v2798_v39  ;;  %2563 = vmatpush3.bf16.msra.mxu0 %v3006_v1 }
 0x68a   :  { %2501 = vmatprep.subr.bf16.mxu1 %v2809_v43  ;;  %2565 = vmatprep.subr.bf16.mxu0 %v3015_v6  ;;  %v2655_v43 = vld [vmem:[%s3662_s2 + $0x8] sm:$0xff] }
 0x68d   :  { %2503 = vmatpush1.bf16.msra.mxu1 %v2847_v56  ;;  %2567 = vmatpush3.bf16.msra.mxu0 %v3039_v24 }
 0x68e   :  { %2505 = vmatprep.subr.bf16.mxu1 %v2864_v61  ;;  %2569 = vmatprep.subr.bf16.mxu0 %v3048_v34  ;;  %v1518_v34 = vld [vmem:[%s3663_s0 + $0xa8] sm:$0xff] }
 0x691   :  { %2507 = vmatpush1.bf16.msra.mxu1 %v2889_v9  ;;  %2571 = vmatpush3.bf16.msra.mxu0 %v3066_v45 }
 0x692   :  { %2509 = vmatprep.subr.bf16.mxu1 %v2901_v15 }
 0x695   :  { %2511 = vmatpush1.bf16.msra.mxu1 %v2925_v27 }
 0x696   :  { %2513 = vmatprep.subr.bf16.mxu1 %v2937_v33 }
 0x699   :  { %2515 = vmatpush1.bf16.msra.mxu1 %v2961_v44  ;;  %v1514_v44 = vld [vmem:[%s3663_s0 + $0xa0] sm:$0xff] }
 0x69a   :  { %2517 = vmatprep.subr.bf16.mxu1 %v2973_v49 }
 0x69d   :  { %2519 = vmatpush1.bf16.msra.mxu1 %v2997_v62 }
 0x69e   :  { %2521 = vmatprep.subr.bf16.mxu1 %v3009_v2 }
 0x6a1   :  { %2523 = vmatpush1.bf16.msra.mxu1 %v3033_v22 }
 0x6a2   :  { %2525 = vmatprep.subr.bf16.mxu1 %v3042_v28 }
 0x6a5   :  { %2527 = vmatpush1.bf16.msra.mxu1 %v3063_v42 }
 0x6a6   :  { %2529 = vmatprep.subr.bf16.mxu1 %v3711_v59 }
 0x6a9   :  { %2531 = vmatpush1.bf16.msra.mxu1 %v3719_v3 }
 0x6aa   :  { %2533 = vmatprep.subr.bf16.mxu1 %v3726_v7 }
 0x6ad   :  { %2535 = vmatpush1.bf16.msra.mxu1 %v3727_v8 }
 0x6ae   :  { %2537 = vmatprep.subr.bf16.mxu1 %v3728_v13 }
 0x6b1   :  { %2539 = vmatpush1.bf16.msra.mxu1 %v3729_v14 }
 0x747   :  { %v1208_v20 = vpop.f32.mrb[12].mxu0  ;;  %v1766_v25 = vpop.f32.mrb[12].mxu1 }
 0x748   :  { %v1209_v31 = vadd.f32 %v2654_v26, %v1208_v20  ;;  %v1210_v32 = vpop.f32.mrb[13].mxu0  ;;  %v1767_v39 = vpop.f32.mrb[13].mxu1 }
 0x749   :  { %v1211_v48 = vadd.f32 %v2655_v43, %v1210_v32  ;;  %v1768_v53 = vadd.f32 %v1767_v39, %v1766_v25 }
 0x74a   :  { %v1283_v56 = vadd.f32 %v1512_v19, %v1209_v31 }
 0x74b   :  { %v1290_v4 = vadd.f32 %v1513_v58, %v1211_v48  ;;  %v1280_v33 = vadd.f32 %v2656_v30, %v1768_v53 }
 0x74c   :  { %v1515_v61 = vmul.f32 -1.442695, %v1283_v56 }
 0x74d   :  { %v1516_v9 = vmul.f32 -1.442695, %v1290_v4 }
 0x74e   :  { %2632 = vpow2.f32 %v1515_v61 }
 0x74f   :  { %2634 = vpow2.f32 %v1516_v9 }
 0x758   :  { %v2633_v12 = vpop.eup %2632 }
 0x759   :  { %v1287_v15 = vadd.f32 1.0, %v2633_v12  ;;  %v2635_v17 = vpop.eup %2634 }
 0x75a   :  { %v1294_v27 = vadd.f32 1.0, %v2635_v17 }
 0x75b   :  { %2636 = vrcp.f32 %v1287_v15 }
 0x75c   :  { %2638 = vrcp.f32 %v1294_v27 }
 0x765   :  { %v2637_v35 = vpop.eup %2636 }
 0x766   :  { %v1297_v47 = vmul.f32 %v2637_v35, %v1280_v33  ;;  %v2639_v51 = vpop.eup %2638 }
 0x767   :  { %v1300_v62 = vsub.f32 1.0, %v2639_v51  ;;  %v1302_v6 = vmul.f32 %v2639_v51, %v3563_v46 }
 0x768   :  { %v1298_v49 = vadd.f32 %v1514_v44, %v1297_v47 }
 0x76a   :  { %2640 = vtanh.f32 %v1298_v49 }
 0x774   :  { %v2641_v1 = vpop.eup %2640 }
 0x775   :  { %v1301_v2 = vmul.f32 %v2641_v1, %v1300_v62 }
 0x777   :  { %v1303_v22 = vadd.f32 %v1302_v6, %v1301_v2 }
 0x779   :  { %1517 = vst [vmem:[%s3664_s4 + $0x30] sm:$0xff] %v1303_v22  ;;  %v1311_v24 = vmul.f32 %v3496_v23, %v1303_v22  ;;  %v1310_v28 = vmul.f32 %v3574_v57, %v1303_v22  ;;  %v1519_v23 = vld [vmem:[%s3663_s0 + $0xb0] sm:$0xff] }
 0x77b   :  { %1376 = vmatprep.mubr.f32.mxu1 %v1311_v24  ;;  %1447 = vmatprep.mubr.f32.mxu0 %v1311_v24 }
 0x77c   :  { %1377 = vmatmul.mubr.f32.vlgmr.msra.gmra.mrb[14].mxu1 %v1310_v28  ;;  %1448 = vmatmul.mubr.f32.vlgmr.msra.gmra.mrb[14].mxu0 %v1310_v28 }
 0x84f   :  { %v1378_v42 = vpop.f32.mrb[14].mxu1  ;;  %v1801_v45 = vpop.f32.mrb[14].mxu0 }
 0x850   :  { %v1379_v59 = vadd.f32 %v2654_v26, %v1378_v42  ;;  %v1380_v40 = vpop.f32.mrb[15].mxu1  ;;  %v1802_v3 = vpop.f32.mrb[15].mxu0 }
 0x851   :  { %v1381_v52 = vadd.f32 %v2655_v43, %v1380_v40  ;;  %v1803_v37 = vadd.f32 %v1802_v3, %v1801_v45 }
 0x852   :  { %v1453_v38 = vadd.f32 %v1518_v34, %v1379_v59 }
 0x853   :  { %v1460_v11 = vadd.f32 %v1519_v23, %v1381_v52  ;;  %v1450_v10 = vadd.f32 %v2656_v30, %v1803_v37 }
 0x854   :  { %v1521_v41 = vmul.f32 -1.442695, %v1453_v38 }
 0x855   :  { %v1522_v21 = vmul.f32 -1.442695, %v1460_v11 }
 0x856   :  { %2642 = vpow2.f32 %v1521_v41 }
 0x857   :  { %2644 = vpow2.f32 %v1522_v21 }
 0x860   :  { %v2643_v63 = vpop.eup %2642 }
 0x861   :  { %v1457_v50 = vadd.f32 1.0, %v2643_v63  ;;  %v2645_v29 = vpop.eup %2644 }
 0x862   :  { %v1464_v16 = vadd.f32 1.0, %v2645_v29 }
 0x863   :  { %2646 = vrcp.f32 %v1457_v50 }
 0x864   :  { %2648 = vrcp.f32 %v1464_v16 }
 0x86d   :  { %v2647_v0 = vpop.eup %2646 }
 0x86e   :  { %v1467_v36 = vmul.f32 %v2647_v0, %v1450_v10  ;;  %v2649_v18 = vpop.eup %2648 }
 0x86f   :  { %v1470_v46 = vsub.f32 1.0, %v2649_v18  ;;  %v1472_v57 = vmul.f32 %v2649_v18, %v1303_v22 }
 0x870   :  { %v1468_v60 = vadd.f32 %v1520_v5, %v1467_v36 }
 0x872   :  { %2650 = vtanh.f32 %v1468_v60 }
 0x87c   :  { %v2651_v55 = vpop.eup %2650 }
 0x87d   :  { %v1471_v54 = vmul.f32 %v2651_v55, %v1470_v46 }
 0x87f   :  { %v1473_v7 = vadd.f32 %v1472_v57, %v1471_v54 }
 0x881   :  { %1523 = vst [vmem:[%s3664_s4 + $0x38] sm:$0xff] %v1473_v7 }

</bundles_post_ra>
